<compile_context>
chip_gen: v5e
topology: v5e:2x2
jax: 0.10.0
libtpu: 0.0.40
codegen_flags: <defaults>
</compile_context>

<pallas_src>
import math
from functools import partial

import jax
import jax.numpy as jnp
from jax.experimental import pallas as pl

CFG = dict(
    vocab_size=128,
    context_length=8,
    embedding_dim=32,   # == d_model  -> dim_project is None (matches the PyTorch branch)
    d_model=32,
    num_heads=4,
    d_ff=64,
    num_layers=2,
    dropout_rate=0.0,   # dropout with rate 0 is the identity (inference semantics)
)

LN_EPS = 1e-5


# ----------------------------- in-kernel helpers -----------------------------

def _layernorm(x, gamma, beta):
    # PyTorch nn.LayerNorm: biased variance over last dim, eps=1e-5
    mean = jnp.mean(x, axis=-1, keepdims=True)
    var = jnp.mean((x - mean) ** 2, axis=-1, keepdims=True)
    return (x - mean) * jax.lax.rsqrt(var + LN_EPS) * gamma + beta


def _erf(x):
    # Abramowitz & Stegun 7.1.26 rational approximation, |err| < 1.5e-7 (~f32 exact).
    # Used because PyTorch nn.GELU() defaults to the exact-erf GELU.
    a1, a2, a3, a4, a5 = (0.254829592, -0.284496736, 1.421413741,
                          -1.453152027, 1.061405429)
    p = 0.3275911
    z = jnp.abs(x)
    t = 1.0 / (1.0 + p * z)
    poly = ((((a5 * t + a4) * t + a3) * t + a2) * t + a1) * t
    e = 1.0 - poly * jnp.exp(-z * z)
    return jnp.where(x >= 0.0, e, -e)


def _gelu_exact(x):
    return 0.5 * x * (1.0 + _erf(x * 0.7071067811865476))


# ------------------------------ fused GPT kernel ------------------------------

def gpt_kernel(x_ref,
               ln1_g_ref, ln1_b_ref, wqkv_ref, bqkv_ref, wo_ref, bo_ref,
               ln2_g_ref, ln2_b_ref, w1_ref, b1_ref, w2_ref, b2_ref,
               lnf_g_ref, lnf_b_ref, wout_ref, bout_ref,
               o_ref, *, num_layers, batch, n_tok, num_heads, d_head):
    scale = 1.0 / math.sqrt(d_head)
    x = x_ref[...]                                                # (N, D), N = B*T
    d_model = x.shape[-1]

    # causal mask (triu, diag=1), hoisted out of the layer/head loops
    row = jax.lax.broadcasted_iota(jnp.int32, (n_tok, n_tok), 0)
    col = jax.lax.broadcasted_iota(jnp.int32, (n_tok, n_tok), 1)
    causal = (col > row)[None]                                    # (1, T, T)

    for l in range(num_layers):                                   # Python-unrolled layers
        # ---------------- attention sub-block: x + proj(attn(ln_1(x))) ----------------
        h1 = _layernorm(x, ln1_g_ref[l], ln1_b_ref[l])
        qkv = jnp.dot(h1, wqkv_ref[l],
                      preferred_element_type=jnp.float32) + bqkv_ref[l]   # (N, 3D)
        q2 = qkv[:, :d_model] * scale            # bake 1/sqrt(dh) into q
        k2 = qkv[:, d_model:2 * d_model]
        v2 = qkv[:, 2 * d_model:]

        wo_l = wo_ref[l]                         # (D, D)
        proj = jnp.zeros_like(x)                 # accumulate ctx @ Wo head-slice by head-slice
        for hd in range(num_heads):              # Python-unrolled heads
            sl = slice(hd * d_head, (hd + 1) * d_head)
            qh = q2[:, sl].reshape(batch, n_tok, d_head)
            kh = k2[:, sl].reshape(batch, n_tok, d_head)
            vh = v2[:, sl].reshape(batch, n_tok, d_head)
            s = jnp.einsum('btd,bsd->bts', qh, kh,
                           preferred_element_type=jnp.float32)    # (B, T, T)
            s = jnp.where(causal, -jnp.inf, s)                    # causal mask
            s = s - jnp.max(s, axis=-1, keepdims=True)            # diag unmasked -> finite max
            p = jnp.exp(s)
            p = p * pl.reciprocal(jnp.sum(p, axis=-1, keepdims=True), approx=True)
            ch = jnp.einsum('bts,bsd->btd', p, vh,
                            preferred_element_type=jnp.float32)   # (B, T, dh)
            ch2 = ch.reshape(batch * n_tok, d_head)
            # ctx @ Wo == sum over heads of ctx_h @ Wo[h*dh:(h+1)*dh, :]
            proj = proj + jnp.dot(ch2, wo_l[sl, :],
                                  preferred_element_type=jnp.float32)
        x = x + proj + bo_ref[l]                                  # x + dropout(attn(ln_1(x)))

        # ---------------- feed-forward sub-block: x + ff(ln_2(x)) ----------------
        h2 = _layernorm(x, ln2_g_ref[l], ln2_b_ref[l])
        h2 = jnp.dot(h2, w1_ref[l], preferred_element_type=jnp.float32) + b1_ref[l]
        h2 = _gelu_exact(h2)
        h2 = jnp.dot(h2, w2_ref[l], preferred_element_type=jnp.float32) + b2_ref[l]
        x = x + h2                                                # x + dropout(ff(ln_2(x)))

    # ---------------- ln_f + tied lm head (all tokens; last-token slice is glue) -------------
    hf = _layernorm(x, lnf_g_ref[...], lnf_b_ref[...])
    # tied weight used untransposed: contract last dims ((1,), (1,)) -> (N, V)
    logits = jax.lax.dot_general(hf, wout_ref[...],
                                 (((1,), (1,)), ((), ())),
                                 preferred_element_type=jnp.float32) + bout_ref[...]
    o_ref[...] = logits


def _full_spec(a):
    ndim = a.ndim
    return pl.BlockSpec(a.shape, lambda i, _n=ndim: (0,) * _n)


# ------------------------------ model (glue + kernel) ------------------------

def init_params(key):
    d, f, v, tc, nl = (CFG['d_model'], CFG['d_ff'], CFG['vocab_size'],
                       CFG['context_length'], CFG['num_layers'])
    std = 0.02
    proj_std = 0.02 / math.sqrt(2 * nl)   # projection.weight special init
    keys = jax.random.split(key, 8)

    def nrm(k, shape, s=std):
        return (s * jax.random.normal(k, shape)).astype(jnp.float32)

    params = dict(
        tok_emb=nrm(keys[0], (v, d)),                 # shared with fc_out (weight tying)
        pos_emb=nrm(keys[1], (tc, d)),
        lnf_g=jnp.ones((1, d), jnp.float32),
        lnf_b=jnp.zeros((1, d), jnp.float32),
        b_out=jnp.zeros((1, v), jnp.float32),
        # per-layer weights stacked along a leading layer axis
        ln1_g=jnp.ones((nl, 1, d), jnp.float32),
        ln1_b=jnp.zeros((nl, 1, d), jnp.float32),
        wqkv=jnp.concatenate([nrm(keys[2], (nl, d, d)),     # fused [Wq | Wk | Wv]
                              nrm(keys[3], (nl, d, d)),
                              nrm(keys[4], (nl, d, d))], axis=-1),
        bqkv=jnp.zeros((nl, 1, 3 * d), jnp.float32),
        wo=nrm(keys[5], (nl, d, d), proj_std),
        bo=jnp.zeros((nl, 1, d), jnp.float32),
        ln2_g=jnp.ones((nl, 1, d), jnp.float32),
        ln2_b=jnp.zeros((nl, 1, d), jnp.float32),
        w1=nrm(keys[6], (nl, d, f)),
        b1=jnp.zeros((nl, 1, f), jnp.float32),
        w2=nrm(keys[7], (nl, f, d)),
        b2=jnp.zeros((nl, 1, d), jnp.float32),
    )
    return params


@jax.jit
def gpt_forward(params, tokens):
    """Equivalent of GPTModel.forward(x, target=None) -> logits for the last token."""
    batch, n_tok = tokens.shape
    d, v = CFG['d_model'], CFG['vocab_size']

    # TODO(synk): token/pos embedding gather stays as plain-JAX glue (data-dependent gather).
    x = params['tok_emb'][tokens]                        # token embedding gather
    x = x + params['pos_emb'][:n_tok][None]              # + positional embedding
    # dropout(rate=0) == identity; embedding_dim == d_model so dim_project is None
    x2d = x.reshape(batch * n_tok, d).astype(jnp.float32)

    args = (x2d,
            params['ln1_g'], params['ln1_b'], params['wqkv'], params['bqkv'],
            params['wo'], params['bo'], params['ln2_g'], params['ln2_b'],
            params['w1'], params['b1'], params['w2'], params['b2'],
            params['lnf_g'], params['lnf_b'], params['tok_emb'], params['b_out'])

    kernel = partial(gpt_kernel,
                     num_layers=CFG['num_layers'], batch=batch, n_tok=n_tok,
                     num_heads=CFG['num_heads'], d_head=d // CFG['num_heads'])

    logits_all = pl.pallas_call(
        kernel,
        grid=(1,),
        in_specs=[_full_spec(a) for a in args],
        out_specs=pl.BlockSpec((batch * n_tok, v), lambda i: (0, 0)),
        out_shape=jax.ShapeDtypeStruct((batch * n_tok, v), jnp.float32),
    )(*args)

    # fc_out(x[:, [-1], :]) — ln_f/head are per-token, so slicing afterwards is identical.
    return logits_all.reshape(batch, n_tok, v)[:, -1:, :]


if __name__ == "__main__":
    key = jax.random.PRNGKey(0)
    pkey, tkey = jax.random.split(key)
    params = init_params(pkey)
    tokens = jax.random.randint(tkey, (2, CFG['context_length']), 0, CFG['vocab_size'])

    logits = gpt_forward(params, tokens)
    jax.block_until_ready(logits)
    assert logits.shape == (2, 1, CFG['vocab_size'])
    assert bool(jnp.all(jnp.isfinite(logits)))
    print("KERNEL_OK")
</pallas_src>

<mosaic_0001>
module attributes {stable_mosaic.version = 11 : i64} {
  func.func @gpt_kernel(%arg0: i32, %arg1: memref<16x32xf32, #tpu.memory_space<vmem>>, %arg2: memref<2x1x32xf32, #tpu.memory_space<vmem>>, %arg3: memref<2x1x32xf32, #tpu.memory_space<vmem>>, %arg4: memref<2x32x96xf32, #tpu.memory_space<vmem>>, %arg5: memref<2x1x96xf32, #tpu.memory_space<vmem>>, %arg6: memref<2x32x32xf32, #tpu.memory_space<vmem>>, %arg7: memref<2x1x32xf32, #tpu.memory_space<vmem>>, %arg8: memref<2x1x32xf32, #tpu.memory_space<vmem>>, %arg9: memref<2x1x32xf32, #tpu.memory_space<vmem>>, %arg10: memref<2x32x64xf32, #tpu.memory_space<vmem>>, %arg11: memref<2x1x64xf32, #tpu.memory_space<vmem>>, %arg12: memref<2x64x32xf32, #tpu.memory_space<vmem>>, %arg13: memref<2x1x32xf32, #tpu.memory_space<vmem>>, %arg14: memref<1x32xf32, #tpu.memory_space<vmem>>, %arg15: memref<1x32xf32, #tpu.memory_space<vmem>>, %arg16: memref<128x32xf32, #tpu.memory_space<vmem>>, %arg17: memref<1x128xf32, #tpu.memory_space<vmem>>, %arg18: memref<16x128xf32, #tpu.memory_space<vmem>>) attributes {dimension_semantics = [#tpu.dimension_semantics<arbitrary>], iteration_bounds = array<i64: 1>, scalar_prefetch = 0 : i64, scratch_operands = 0 : i64, tpu.core_type = #tpu.core_type<tc>, window_params = [{pipeline_mode = #tpu.pipeline_mode<synchronous>, transform_indices = @transform_0, window_bounds = array<i64: 16, 32>}, {pipeline_mode = #tpu.pipeline_mode<synchronous>, transform_indices = @transform_1, window_bounds = array<i64: 2, 1, 32>}, {pipeline_mode = #tpu.pipeline_mode<synchronous>, transform_indices = @transform_2, window_bounds = array<i64: 2, 1, 32>}, {pipeline_mode = #tpu.pipeline_mode<synchronous>, transform_indices = @transform_3, window_bounds = array<i64: 2, 32, 96>}, {pipeline_mode = #tpu.pipeline_mode<synchronous>, transform_indices = @transform_4, window_bounds = array<i64: 2, 1, 96>}, {pipeline_mode = #tpu.pipeline_mode<synchronous>, transform_indices = @transform_5, window_bounds = array<i64: 2, 32, 32>}, {pipeline_mode = #tpu.pipeline_mode<synchronous>, transform_indices = @transform_6, window_bounds = array<i64: 2, 1, 32>}, {pipeline_mode = #tpu.pipeline_mode<synchronous>, transform_indices = @transform_7, window_bounds = array<i64: 2, 1, 32>}, {pipeline_mode = #tpu.pipeline_mode<synchronous>, transform_indices = @transform_8, window_bounds = array<i64: 2, 1, 32>}, {pipeline_mode = #tpu.pipeline_mode<synchronous>, transform_indices = @transform_9, window_bounds = array<i64: 2, 32, 64>}, {pipeline_mode = #tpu.pipeline_mode<synchronous>, transform_indices = @transform_10, window_bounds = array<i64: 2, 1, 64>}, {pipeline_mode = #tpu.pipeline_mode<synchronous>, transform_indices = @transform_11, window_bounds = array<i64: 2, 64, 32>}, {pipeline_mode = #tpu.pipeline_mode<synchronous>, transform_indices = @transform_12, window_bounds = array<i64: 2, 1, 32>}, {pipeline_mode = #tpu.pipeline_mode<synchronous>, transform_indices = @transform_13, window_bounds = array<i64: 1, 32>}, {pipeline_mode = #tpu.pipeline_mode<synchronous>, transform_indices = @transform_14, window_bounds = array<i64: 1, 32>}, {pipeline_mode = #tpu.pipeline_mode<synchronous>, transform_indices = @transform_15, window_bounds = array<i64: 128, 32>}, {pipeline_mode = #tpu.pipeline_mode<synchronous>, transform_indices = @transform_16, window_bounds = array<i64: 1, 128>}, {pipeline_mode = #tpu.pipeline_mode<synchronous>, transform_indices = @transform_17, window_bounds = array<i64: 16, 128>}]} {
    %c0 = arith.constant 0 : index
    %c0_0 = arith.constant 0 : index
    %0 = vector.load %arg1[%c0, %c0_0] : memref<16x32xf32, #tpu.memory_space<vmem>>, vector<16x32xf32>
    %1 = tpu.iota {dimensions = array<i32: 0>} : vector<8x8xi32>
    %2 = tpu.iota {dimensions = array<i32: 1>} : vector<8x8xi32>
    %3 = arith.cmpi sgt, %2, %1 : vector<8x8xi32>
    %4 = vector.shape_cast %3 : vector<8x8xi1> to vector<1x8x8xi1>
    %c0_1 = arith.constant 0 : index
    %c0_2 = arith.constant 0 : index
    %c0_3 = arith.constant 0 : index
    %5 = vector.load %arg2[%c0_1, %c0_2, %c0_3] : memref<2x1x32xf32, #tpu.memory_space<vmem>>, vector<1x1x32xf32>
    %6 = vector.shape_cast %5 : vector<1x1x32xf32> to vector<1x32xf32>
    %c0_4 = arith.constant 0 : index
    %c0_5 = arith.constant 0 : index
    %c0_6 = arith.constant 0 : index
    %7 = vector.load %arg3[%c0_4, %c0_5, %c0_6] : memref<2x1x32xf32, #tpu.memory_space<vmem>>, vector<1x1x32xf32>
    %8 = vector.shape_cast %7 : vector<1x1x32xf32> to vector<1x32xf32>
    %cst = arith.constant dense<0.000000e+00> : vector<16xf32>
    %9 = vector.multi_reduction <add>, %0, %cst [1] : vector<16x32xf32> to vector<16xf32>
    %10 = vector.shape_cast %9 : vector<16xf32> to vector<16x1xf32>
    %cst_7 = arith.constant 3.200000e+01 : f32
    %11 = vector.broadcast %cst_7 : f32 to vector<16x1xf32>
    %12 = arith.divf %10, %11 : vector<16x1xf32>
    %13 = vector.broadcast %12 : vector<16x1xf32> to vector<16x32xf32>
    %14 = arith.subf %0, %13 : vector<16x32xf32>
    %15 = arith.mulf %14, %14 : vector<16x32xf32>
    %cst_8 = arith.constant dense<0.000000e+00> : vector<16xf32>
    %16 = vector.multi_reduction <add>, %15, %cst_8 [1] : vector<16x32xf32> to vector<16xf32>
    %17 = vector.shape_cast %16 : vector<16xf32> to vector<16x1xf32>
    %cst_9 = arith.constant 3.200000e+01 : f32
    %18 = vector.broadcast %cst_9 : f32 to vector<16x1xf32>
    %19 = arith.divf %17, %18 : vector<16x1xf32>
    %20 = vector.broadcast %12 : vector<16x1xf32> to vector<16x32xf32>
    %21 = arith.subf %0, %20 : vector<16x32xf32>
    %cst_10 = arith.constant 9.99999974E-6 : f32
    %22 = vector.broadcast %cst_10 : f32 to vector<16x1xf32>
    %23 = arith.addf %19, %22 : vector<16x1xf32>
    %24 = math.rsqrt %23 : vector<16x1xf32>
    %25 = vector.broadcast %24 : vector<16x1xf32> to vector<16x32xf32>
    %26 = arith.mulf %21, %25 : vector<16x32xf32>
    %27 = vector.broadcast %6 : vector<1x32xf32> to vector<16x32xf32>
    %28 = arith.mulf %26, %27 : vector<16x32xf32>
    %29 = vector.broadcast %8 : vector<1x32xf32> to vector<16x32xf32>
    %30 = arith.addf %28, %29 : vector<16x32xf32>
    %c0_11 = arith.constant 0 : index
    %c0_12 = arith.constant 0 : index
    %c0_13 = arith.constant 0 : index
    %31 = vector.load %arg4[%c0_11, %c0_12, %c0_13] : memref<2x32x96xf32, #tpu.memory_space<vmem>>, vector<1x32x96xf32>
    %32 = vector.shape_cast %31 : vector<1x32x96xf32> to vector<32x96xf32>
    %cst_14 = arith.constant dense<0.000000e+00> : vector<16x96xf32>
    %33 = tpu.matmul %30, %32, %cst_14 {dimension_numbers = #tpu.dot_dimension_numbers<[1], [0], [0], [1], [0, 0, 1, 1], [], []>} : vector<16x32xf32>, vector<32x96xf32>, vector<16x96xf32> -> vector<16x96xf32>
    %c0_15 = arith.constant 0 : index
    %c0_16 = arith.constant 0 : index
    %c0_17 = arith.constant 0 : index
    %34 = vector.load %arg5[%c0_15, %c0_16, %c0_17] : memref<2x1x96xf32, #tpu.memory_space<vmem>>, vector<1x1x96xf32>
    %35 = vector.shape_cast %34 : vector<1x1x96xf32> to vector<1x96xf32>
    %36 = vector.broadcast %35 : vector<1x96xf32> to vector<16x96xf32>
    %37 = arith.addf %33, %36 : vector<16x96xf32>
    %38 = vector.extract_strided_slice %37 {offsets = [0, 0], sizes = [16, 32], strides = [1, 1]} : vector<16x96xf32> to vector<16x32xf32>
    %cst_18 = arith.constant 0.353553385 : f32
    %39 = vector.broadcast %cst_18 : f32 to vector<16x32xf32>
    %40 = arith.mulf %38, %39 : vector<16x32xf32>
    %41 = vector.extract_strided_slice %37 {offsets = [0, 32], sizes = [16, 32], strides = [1, 1]} : vector<16x96xf32> to vector<16x32xf32>
    %42 = vector.extract_strided_slice %37 {offsets = [0, 64], sizes = [16, 32], strides = [1, 1]} : vector<16x96xf32> to vector<16x32xf32>
    %c0_19 = arith.constant 0 : index
    %c0_20 = arith.constant 0 : index
    %c0_21 = arith.constant 0 : index
    %43 = vector.load %arg6[%c0_19, %c0_20, %c0_21] : memref<2x32x32xf32, #tpu.memory_space<vmem>>, vector<1x32x32xf32>
    %44 = vector.shape_cast %43 : vector<1x32x32xf32> to vector<32x32xf32>
    %cst_22 = arith.constant 0.000000e+00 : f32
    %45 = vector.broadcast %cst_22 : f32 to vector<16x32xf32>
    %46 = vector.extract_strided_slice %40 {offsets = [0, 0], sizes = [16, 8], strides = [1, 1]} : vector<16x32xf32> to vector<16x8xf32>
    %47 = vector.shape_cast %46 : vector<16x8xf32> to vector<2x8x8xf32>
    %48 = vector.extract_strided_slice %41 {offsets = [0, 0], sizes = [16, 8], strides = [1, 1]} : vector<16x32xf32> to vector<16x8xf32>
    %49 = vector.shape_cast %48 : vector<16x8xf32> to vector<2x8x8xf32>
    %50 = vector.extract_strided_slice %42 {offsets = [0, 0], sizes = [16, 8], strides = [1, 1]} : vector<16x32xf32> to vector<16x8xf32>
    %51 = vector.shape_cast %50 : vector<16x8xf32> to vector<2x8x8xf32>
    "tpu.trace_start"() <{level = 10 : i32, message = "btd,bsd->bts"}> : () -> ()
    %cst_23 = arith.constant dense<0.000000e+00> : vector<2x8x8xf32>
    %52 = tpu.matmul %47, %49, %cst_23 {dimension_numbers = #tpu.dot_dimension_numbers<[2], [2], [1], [1], [0, 0, 0, 1, 1, 1], [0], [0]>} : vector<2x8x8xf32>, vector<2x8x8xf32>, vector<2x8x8xf32> -> vector<2x8x8xf32>
    %cst_24 = arith.constant 0xFF800000 : f32
    "tpu.trace_stop"() : () -> ()
    %53 = vector.shape_cast %4 : vector<1x8x8xi1> to vector<1x8x8xi1>
    %54 = vector.broadcast %53 : vector<1x8x8xi1> to vector<2x8x8xi1>
    %55 = vector.broadcast %cst_24 : f32 to vector<2x8x8xf32>
    %56 = arith.select %54, %55, %52 : vector<2x8x8xi1>, vector<2x8x8xf32>
    %cst_25 = arith.constant dense<0xFF800000> : vector<2x8xf32>
    %57 = vector.multi_reduction <maximumf>, %56, %cst_25 [2] : vector<2x8x8xf32> to vector<2x8xf32>
    %58 = vector.shape_cast %57 : vector<2x8xf32> to vector<2x8x1xf32>
    %59 = vector.broadcast %58 : vector<2x8x1xf32> to vector<2x8x8xf32>
    %60 = arith.subf %56, %59 : vector<2x8x8xf32>
    %61 = math.exp %60 : vector<2x8x8xf32>
    %cst_26 = arith.constant dense<0.000000e+00> : vector<2x8xf32>
    %62 = vector.multi_reduction <add>, %61, %cst_26 [2] : vector<2x8x8xf32> to vector<2x8xf32>
    %63 = vector.shape_cast %62 : vector<2x8xf32> to vector<2x8x1xf32>
    %64 = tpu.reciprocal %63 {approx = true} : vector<2x8x1xf32> -> vector<2x8x1xf32>
    %65 = vector.broadcast %64 : vector<2x8x1xf32> to vector<2x8x8xf32>
    %66 = arith.mulf %61, %65 : vector<2x8x8xf32>
    "tpu.trace_start"() <{level = 10 : i32, message = "bts,bsd->btd"}> : () -> ()
    %cst_27 = arith.constant dense<0.000000e+00> : vector<2x8x8xf32>
    %67 = tpu.matmul %66, %51, %cst_27 {dimension_numbers = #tpu.dot_dimension_numbers<[2], [1], [1], [2], [0, 0, 0, 1, 1, 2], [0], [0]>} : vector<2x8x8xf32>, vector<2x8x8xf32>, vector<2x8x8xf32> -> vector<2x8x8xf32>
    "tpu.trace_stop"() : () -> ()
    %68 = vector.shape_cast %67 : vector<2x8x8xf32> to vector<16x8xf32>
    %69 = vector.extract_strided_slice %44 {offsets = [0, 0], sizes = [8, 32], strides = [1, 1]} : vector<32x32xf32> to vector<8x32xf32>
    %cst_28 = arith.constant dense<0.000000e+00> : vector<16x32xf32>
    %70 = tpu.matmul %68, %69, %cst_28 {dimension_numbers = #tpu.dot_dimension_numbers<[1], [0], [0], [1], [0, 0, 1, 1], [], []>} : vector<16x8xf32>, vector<8x32xf32>, vector<16x32xf32> -> vector<16x32xf32>
    %71 = arith.addf %45, %70 : vector<16x32xf32>
    %72 = vector.extract_strided_slice %40 {offsets = [0, 8], sizes = [16, 8], strides = [1, 1]} : vector<16x32xf32> to vector<16x8xf32>
    %73 = vector.shape_cast %72 : vector<16x8xf32> to vector<2x8x8xf32>
    %74 = vector.extract_strided_slice %41 {offsets = [0, 8], sizes = [16, 8], strides = [1, 1]} : vector<16x32xf32> to vector<16x8xf32>
    %75 = vector.shape_cast %74 : vector<16x8xf32> to vector<2x8x8xf32>
    %76 = vector.extract_strided_slice %42 {offsets = [0, 8], sizes = [16, 8], strides = [1, 1]} : vector<16x32xf32> to vector<16x8xf32>
    %77 = vector.shape_cast %76 : vector<16x8xf32> to vector<2x8x8xf32>
    "tpu.trace_start"() <{level = 10 : i32, message = "btd,bsd->bts"}> : () -> ()
    %cst_29 = arith.constant dense<0.000000e+00> : vector<2x8x8xf32>
    %78 = tpu.matmul %73, %75, %cst_29 {dimension_numbers = #tpu.dot_dimension_numbers<[2], [2], [1], [1], [0, 0, 0, 1, 1, 1], [0], [0]>} : vector<2x8x8xf32>, vector<2x8x8xf32>, vector<2x8x8xf32> -> vector<2x8x8xf32>
    %cst_30 = arith.constant 0xFF800000 : f32
    "tpu.trace_stop"() : () -> ()
    %79 = vector.shape_cast %4 : vector<1x8x8xi1> to vector<1x8x8xi1>
    %80 = vector.broadcast %79 : vector<1x8x8xi1> to vector<2x8x8xi1>
    %81 = vector.broadcast %cst_30 : f32 to vector<2x8x8xf32>
    %82 = arith.select %80, %81, %78 : vector<2x8x8xi1>, vector<2x8x8xf32>
    %cst_31 = arith.constant dense<0xFF800000> : vector<2x8xf32>
    %83 = vector.multi_reduction <maximumf>, %82, %cst_31 [2] : vector<2x8x8xf32> to vector<2x8xf32>
    %84 = vector.shape_cast %83 : vector<2x8xf32> to vector<2x8x1xf32>
    %85 = vector.broadcast %84 : vector<2x8x1xf32> to vector<2x8x8xf32>
    %86 = arith.subf %82, %85 : vector<2x8x8xf32>
    %87 = math.exp %86 : vector<2x8x8xf32>
    %cst_32 = arith.constant dense<0.000000e+00> : vector<2x8xf32>
    %88 = vector.multi_reduction <add>, %87, %cst_32 [2] : vector<2x8x8xf32> to vector<2x8xf32>
    %89 = vector.shape_cast %88 : vector<2x8xf32> to vector<2x8x1xf32>
    %90 = tpu.reciprocal %89 {approx = true} : vector<2x8x1xf32> -> vector<2x8x1xf32>
    %91 = vector.broadcast %90 : vector<2x8x1xf32> to vector<2x8x8xf32>
    %92 = arith.mulf %87, %91 : vector<2x8x8xf32>
    "tpu.trace_start"() <{level = 10 : i32, message = "bts,bsd->btd"}> : () -> ()
    %cst_33 = arith.constant dense<0.000000e+00> : vector<2x8x8xf32>
    %93 = tpu.matmul %92, %77, %cst_33 {dimension_numbers = #tpu.dot_dimension_numbers<[2], [1], [1], [2], [0, 0, 0, 1, 1, 2], [0], [0]>} : vector<2x8x8xf32>, vector<2x8x8xf32>, vector<2x8x8xf32> -> vector<2x8x8xf32>
    "tpu.trace_stop"() : () -> ()
    %94 = vector.shape_cast %93 : vector<2x8x8xf32> to vector<16x8xf32>
    %95 = vector.extract_strided_slice %44 {offsets = [8, 0], sizes = [8, 32], strides = [1, 1]} : vector<32x32xf32> to vector<8x32xf32>
    %cst_34 = arith.constant dense<0.000000e+00> : vector<16x32xf32>
    %96 = tpu.matmul %94, %95, %cst_34 {dimension_numbers = #tpu.dot_dimension_numbers<[1], [0], [0], [1], [0, 0, 1, 1], [], []>} : vector<16x8xf32>, vector<8x32xf32>, vector<16x32xf32> -> vector<16x32xf32>
    %97 = arith.addf %71, %96 : vector<16x32xf32>
    %98 = vector.extract_strided_slice %40 {offsets = [0, 16], sizes = [16, 8], strides = [1, 1]} : vector<16x32xf32> to vector<16x8xf32>
    %99 = vector.shape_cast %98 : vector<16x8xf32> to vector<2x8x8xf32>
    %100 = vector.extract_strided_slice %41 {offsets = [0, 16], sizes = [16, 8], strides = [1, 1]} : vector<16x32xf32> to vector<16x8xf32>
    %101 = vector.shape_cast %100 : vector<16x8xf32> to vector<2x8x8xf32>
    %102 = vector.extract_strided_slice %42 {offsets = [0, 16], sizes = [16, 8], strides = [1, 1]} : vector<16x32xf32> to vector<16x8xf32>
    %103 = vector.shape_cast %102 : vector<16x8xf32> to vector<2x8x8xf32>
    "tpu.trace_start"() <{level = 10 : i32, message = "btd,bsd->bts"}> : () -> ()
    %cst_35 = arith.constant dense<0.000000e+00> : vector<2x8x8xf32>
    %104 = tpu.matmul %99, %101, %cst_35 {dimension_numbers = #tpu.dot_dimension_numbers<[2], [2], [1], [1], [0, 0, 0, 1, 1, 1], [0], [0]>} : vector<2x8x8xf32>, vector<2x8x8xf32>, vector<2x8x8xf32> -> vector<2x8x8xf32>
    %cst_36 = arith.constant 0xFF800000 : f32
    "tpu.trace_stop"() : () -> ()
    %105 = vector.shape_cast %4 : vector<1x8x8xi1> to vector<1x8x8xi1>
    %106 = vector.broadcast %105 : vector<1x8x8xi1> to vector<2x8x8xi1>
    %107 = vector.broadcast %cst_36 : f32 to vector<2x8x8xf32>
    %108 = arith.select %106, %107, %104 : vector<2x8x8xi1>, vector<2x8x8xf32>
    %cst_37 = arith.constant dense<0xFF800000> : vector<2x8xf32>
    %109 = vector.multi_reduction <maximumf>, %108, %cst_37 [2] : vector<2x8x8xf32> to vector<2x8xf32>
    %110 = vector.shape_cast %109 : vector<2x8xf32> to vector<2x8x1xf32>
    %111 = vector.broadcast %110 : vector<2x8x1xf32> to vector<2x8x8xf32>
    %112 = arith.subf %108, %111 : vector<2x8x8xf32>
    %113 = math.exp %112 : vector<2x8x8xf32>
    %cst_38 = arith.constant dense<0.000000e+00> : vector<2x8xf32>
    %114 = vector.multi_reduction <add>, %113, %cst_38 [2] : vector<2x8x8xf32> to vector<2x8xf32>
    %115 = vector.shape_cast %114 : vector<2x8xf32> to vector<2x8x1xf32>
    %116 = tpu.reciprocal %115 {approx = true} : vector<2x8x1xf32> -> vector<2x8x1xf32>
    %117 = vector.broadcast %116 : vector<2x8x1xf32> to vector<2x8x8xf32>
    %118 = arith.mulf %113, %117 : vector<2x8x8xf32>
    "tpu.trace_start"() <{level = 10 : i32, message = "bts,bsd->btd"}> : () -> ()
    %cst_39 = arith.constant dense<0.000000e+00> : vector<2x8x8xf32>
    %119 = tpu.matmul %118, %103, %cst_39 {dimension_numbers = #tpu.dot_dimension_numbers<[2], [1], [1], [2], [0, 0, 0, 1, 1, 2], [0], [0]>} : vector<2x8x8xf32>, vector<2x8x8xf32>, vector<2x8x8xf32> -> vector<2x8x8xf32>
    "tpu.trace_stop"() : () -> ()
    %120 = vector.shape_cast %119 : vector<2x8x8xf32> to vector<16x8xf32>
    %121 = vector.extract_strided_slice %44 {offsets = [16, 0], sizes = [8, 32], strides = [1, 1]} : vector<32x32xf32> to vector<8x32xf32>
    %cst_40 = arith.constant dense<0.000000e+00> : vector<16x32xf32>
    %122 = tpu.matmul %120, %121, %cst_40 {dimension_numbers = #tpu.dot_dimension_numbers<[1], [0], [0], [1], [0, 0, 1, 1], [], []>} : vector<16x8xf32>, vector<8x32xf32>, vector<16x32xf32> -> vector<16x32xf32>
    %123 = arith.addf %97, %122 : vector<16x32xf32>
    %124 = vector.extract_strided_slice %40 {offsets = [0, 24], sizes = [16, 8], strides = [1, 1]} : vector<16x32xf32> to vector<16x8xf32>
    %125 = vector.shape_cast %124 : vector<16x8xf32> to vector<2x8x8xf32>
    %126 = vector.extract_strided_slice %41 {offsets = [0, 24], sizes = [16, 8], strides = [1, 1]} : vector<16x32xf32> to vector<16x8xf32>
    %127 = vector.shape_cast %126 : vector<16x8xf32> to vector<2x8x8xf32>
    %128 = vector.extract_strided_slice %42 {offsets = [0, 24], sizes = [16, 8], strides = [1, 1]} : vector<16x32xf32> to vector<16x8xf32>
    %129 = vector.shape_cast %128 : vector<16x8xf32> to vector<2x8x8xf32>
    "tpu.trace_start"() <{level = 10 : i32, message = "btd,bsd->bts"}> : () -> ()
    %cst_41 = arith.constant dense<0.000000e+00> : vector<2x8x8xf32>
    %130 = tpu.matmul %125, %127, %cst_41 {dimension_numbers = #tpu.dot_dimension_numbers<[2], [2], [1], [1], [0, 0, 0, 1, 1, 1], [0], [0]>} : vector<2x8x8xf32>, vector<2x8x8xf32>, vector<2x8x8xf32> -> vector<2x8x8xf32>
    %cst_42 = arith.constant 0xFF800000 : f32
    "tpu.trace_stop"() : () -> ()
    %131 = vector.shape_cast %4 : vector<1x8x8xi1> to vector<1x8x8xi1>
    %132 = vector.broadcast %131 : vector<1x8x8xi1> to vector<2x8x8xi1>
    %133 = vector.broadcast %cst_42 : f32 to vector<2x8x8xf32>
    %134 = arith.select %132, %133, %130 : vector<2x8x8xi1>, vector<2x8x8xf32>
    %cst_43 = arith.constant dense<0xFF800000> : vector<2x8xf32>
    %135 = vector.multi_reduction <maximumf>, %134, %cst_43 [2] : vector<2x8x8xf32> to vector<2x8xf32>
    %136 = vector.shape_cast %135 : vector<2x8xf32> to vector<2x8x1xf32>
    %137 = vector.broadcast %136 : vector<2x8x1xf32> to vector<2x8x8xf32>
    %138 = arith.subf %134, %137 : vector<2x8x8xf32>
    %139 = math.exp %138 : vector<2x8x8xf32>
    %cst_44 = arith.constant dense<0.000000e+00> : vector<2x8xf32>
    %140 = vector.multi_reduction <add>, %139, %cst_44 [2] : vector<2x8x8xf32> to vector<2x8xf32>
    %141 = vector.shape_cast %140 : vector<2x8xf32> to vector<2x8x1xf32>
    %142 = tpu.reciprocal %141 {approx = true} : vector<2x8x1xf32> -> vector<2x8x1xf32>
    %143 = vector.broadcast %142 : vector<2x8x1xf32> to vector<2x8x8xf32>
    %144 = arith.mulf %139, %143 : vector<2x8x8xf32>
    "tpu.trace_start"() <{level = 10 : i32, message = "bts,bsd->btd"}> : () -> ()
    %cst_45 = arith.constant dense<0.000000e+00> : vector<2x8x8xf32>
    %145 = tpu.matmul %144, %129, %cst_45 {dimension_numbers = #tpu.dot_dimension_numbers<[2], [1], [1], [2], [0, 0, 0, 1, 1, 2], [0], [0]>} : vector<2x8x8xf32>, vector<2x8x8xf32>, vector<2x8x8xf32> -> vector<2x8x8xf32>
    "tpu.trace_stop"() : () -> ()
    %146 = vector.shape_cast %145 : vector<2x8x8xf32> to vector<16x8xf32>
    %147 = vector.extract_strided_slice %44 {offsets = [24, 0], sizes = [8, 32], strides = [1, 1]} : vector<32x32xf32> to vector<8x32xf32>
    %cst_46 = arith.constant dense<0.000000e+00> : vector<16x32xf32>
    %148 = tpu.matmul %146, %147, %cst_46 {dimension_numbers = #tpu.dot_dimension_numbers<[1], [0], [0], [1], [0, 0, 1, 1], [], []>} : vector<16x8xf32>, vector<8x32xf32>, vector<16x32xf32> -> vector<16x32xf32>
    %149 = arith.addf %123, %148 : vector<16x32xf32>
    %150 = arith.addf %0, %149 : vector<16x32xf32>
    %c0_47 = arith.constant 0 : index
    %c0_48 = arith.constant 0 : index
    %c0_49 = arith.constant 0 : index
    %151 = vector.load %arg7[%c0_47, %c0_48, %c0_49] : memref<2x1x32xf32, #tpu.memory_space<vmem>>, vector<1x1x32xf32>
    %152 = vector.shape_cast %151 : vector<1x1x32xf32> to vector<1x32xf32>
    %153 = vector.broadcast %152 : vector<1x32xf32> to vector<16x32xf32>
    %154 = arith.addf %150, %153 : vector<16x32xf32>
    %c0_50 = arith.constant 0 : index
    %c0_51 = arith.constant 0 : index
    %c0_52 = arith.constant 0 : index
    %155 = vector.load %arg8[%c0_50, %c0_51, %c0_52] : memref<2x1x32xf32, #tpu.memory_space<vmem>>, vector<1x1x32xf32>
    %156 = vector.shape_cast %155 : vector<1x1x32xf32> to vector<1x32xf32>
    %c0_53 = arith.constant 0 : index
    %c0_54 = arith.constant 0 : index
    %c0_55 = arith.constant 0 : index
    %157 = vector.load %arg9[%c0_53, %c0_54, %c0_55] : memref<2x1x32xf32, #tpu.memory_space<vmem>>, vector<1x1x32xf32>
    %158 = vector.shape_cast %157 : vector<1x1x32xf32> to vector<1x32xf32>
    %cst_56 = arith.constant dense<0.000000e+00> : vector<16xf32>
    %159 = vector.multi_reduction <add>, %154, %cst_56 [1] : vector<16x32xf32> to vector<16xf32>
    %160 = vector.shape_cast %159 : vector<16xf32> to vector<16x1xf32>
    %cst_57 = arith.constant 3.200000e+01 : f32
    %161 = vector.broadcast %cst_57 : f32 to vector<16x1xf32>
    %162 = arith.divf %160, %161 : vector<16x1xf32>
    %163 = vector.broadcast %162 : vector<16x1xf32> to vector<16x32xf32>
    %164 = arith.subf %154, %163 : vector<16x32xf32>
    %165 = arith.mulf %164, %164 : vector<16x32xf32>
    %cst_58 = arith.constant dense<0.000000e+00> : vector<16xf32>
    %166 = vector.multi_reduction <add>, %165, %cst_58 [1] : vector<16x32xf32> to vector<16xf32>
    %167 = vector.shape_cast %166 : vector<16xf32> to vector<16x1xf32>
    %cst_59 = arith.constant 3.200000e+01 : f32
    %168 = vector.broadcast %cst_59 : f32 to vector<16x1xf32>
    %169 = arith.divf %167, %168 : vector<16x1xf32>
    %170 = vector.broadcast %162 : vector<16x1xf32> to vector<16x32xf32>
    %171 = arith.subf %154, %170 : vector<16x32xf32>
    %cst_60 = arith.constant 9.99999974E-6 : f32
    %172 = vector.broadcast %cst_60 : f32 to vector<16x1xf32>
    %173 = arith.addf %169, %172 : vector<16x1xf32>
    %174 = math.rsqrt %173 : vector<16x1xf32>
    %175 = vector.broadcast %174 : vector<16x1xf32> to vector<16x32xf32>
    %176 = arith.mulf %171, %175 : vector<16x32xf32>
    %177 = vector.broadcast %156 : vector<1x32xf32> to vector<16x32xf32>
    %178 = arith.mulf %176, %177 : vector<16x32xf32>
    %179 = vector.broadcast %158 : vector<1x32xf32> to vector<16x32xf32>
    %180 = arith.addf %178, %179 : vector<16x32xf32>
    %c0_61 = arith.constant 0 : index
    %c0_62 = arith.constant 0 : index
    %c0_63 = arith.constant 0 : index
    %181 = vector.load %arg10[%c0_61, %c0_62, %c0_63] : memref<2x32x64xf32, #tpu.memory_space<vmem>>, vector<1x32x64xf32>
    %182 = vector.shape_cast %181 : vector<1x32x64xf32> to vector<32x64xf32>
    %cst_64 = arith.constant dense<0.000000e+00> : vector<16x64xf32>
    %183 = tpu.matmul %180, %182, %cst_64 {dimension_numbers = #tpu.dot_dimension_numbers<[1], [0], [0], [1], [0, 0, 1, 1], [], []>} : vector<16x32xf32>, vector<32x64xf32>, vector<16x64xf32> -> vector<16x64xf32>
    %c0_65 = arith.constant 0 : index
    %c0_66 = arith.constant 0 : index
    %c0_67 = arith.constant 0 : index
    %184 = vector.load %arg11[%c0_65, %c0_66, %c0_67] : memref<2x1x64xf32, #tpu.memory_space<vmem>>, vector<1x1x64xf32>
    %185 = vector.shape_cast %184 : vector<1x1x64xf32> to vector<1x64xf32>
    %186 = vector.broadcast %185 : vector<1x64xf32> to vector<16x64xf32>
    %187 = arith.addf %183, %186 : vector<16x64xf32>
    %cst_68 = arith.constant 5.000000e-01 : f32
    %188 = vector.broadcast %cst_68 : f32 to vector<16x64xf32>
    %189 = arith.mulf %188, %187 : vector<16x64xf32>
    %cst_69 = arith.constant 0.707106769 : f32
    %190 = vector.broadcast %cst_69 : f32 to vector<16x64xf32>
    %191 = arith.mulf %187, %190 : vector<16x64xf32>
    %192 = math.absf %191 : vector<16x64xf32>
    %cst_70 = arith.constant 0.327591091 : f32
    %193 = vector.broadcast %cst_70 : f32 to vector<16x64xf32>
    %194 = arith.mulf %193, %192 : vector<16x64xf32>
    %cst_71 = arith.constant 1.000000e+00 : f32
    %195 = vector.broadcast %cst_71 : f32 to vector<16x64xf32>
    %196 = arith.addf %195, %194 : vector<16x64xf32>
    %cst_72 = arith.constant 1.000000e+00 : f32
    %197 = vector.broadcast %cst_72 : f32 to vector<16x64xf32>
    %198 = arith.divf %197, %196 : vector<16x64xf32>
    %cst_73 = arith.constant 1.06140542 : f32
    %199 = vector.broadcast %cst_73 : f32 to vector<16x64xf32>
    %200 = arith.mulf %199, %198 : vector<16x64xf32>
    %cst_74 = arith.constant -1.45315206 : f32
    %201 = vector.broadcast %cst_74 : f32 to vector<16x64xf32>
    %202 = arith.addf %200, %201 : vector<16x64xf32>
    %203 = arith.mulf %202, %198 : vector<16x64xf32>
    %cst_75 = arith.constant 1.42141378 : f32
    %204 = vector.broadcast %cst_75 : f32 to vector<16x64xf32>
    %205 = arith.addf %203, %204 : vector<16x64xf32>
    %206 = arith.mulf %205, %198 : vector<16x64xf32>
    %cst_76 = arith.constant -0.284496725 : f32
    %207 = vector.broadcast %cst_76 : f32 to vector<16x64xf32>
    %208 = arith.addf %206, %207 : vector<16x64xf32>
    %209 = arith.mulf %208, %198 : vector<16x64xf32>
    %cst_77 = arith.constant 0.254829586 : f32
    %210 = vector.broadcast %cst_77 : f32 to vector<16x64xf32>
    %211 = arith.addf %209, %210 : vector<16x64xf32>
    %212 = arith.mulf %211, %198 : vector<16x64xf32>
    %cst_78 = arith.constant 0.000000e+00 : f32
    %213 = vector.broadcast %cst_78 : f32 to vector<16x64xf32>
    %214 = arith.subf %213, %192 : vector<16x64xf32>
    %215 = arith.mulf %214, %192 : vector<16x64xf32>
    %216 = math.exp %215 : vector<16x64xf32>
    %217 = arith.mulf %212, %216 : vector<16x64xf32>
    %cst_79 = arith.constant 1.000000e+00 : f32
    %218 = vector.broadcast %cst_79 : f32 to vector<16x64xf32>
    %219 = arith.subf %218, %217 : vector<16x64xf32>
    %cst_80 = arith.constant 0.000000e+00 : f32
    %220 = vector.broadcast %cst_80 : f32 to vector<16x64xf32>
    %221 = arith.cmpf oge, %191, %220 : vector<16x64xf32>
    %cst_81 = arith.constant 0.000000e+00 : f32
    %222 = vector.broadcast %cst_81 : f32 to vector<16x64xf32>
    %223 = arith.subf %222, %219 : vector<16x64xf32>
    %224 = arith.select %221, %219, %223 : vector<16x64xi1>, vector<16x64xf32>
    %cst_82 = arith.constant 1.000000e+00 : f32
    %225 = vector.broadcast %cst_82 : f32 to vector<16x64xf32>
    %226 = arith.addf %225, %224 : vector<16x64xf32>
    %227 = arith.mulf %189, %226 : vector<16x64xf32>
    %c0_83 = arith.constant 0 : index
    %c0_84 = arith.constant 0 : index
    %c0_85 = arith.constant 0 : index
    %228 = vector.load %arg12[%c0_83, %c0_84, %c0_85] : memref<2x64x32xf32, #tpu.memory_space<vmem>>, vector<1x64x32xf32>
    %229 = vector.shape_cast %228 : vector<1x64x32xf32> to vector<64x32xf32>
    %cst_86 = arith.constant dense<0.000000e+00> : vector<16x32xf32>
    %230 = tpu.matmul %227, %229, %cst_86 {dimension_numbers = #tpu.dot_dimension_numbers<[1], [0], [0], [1], [0, 0, 1, 1], [], []>} : vector<16x64xf32>, vector<64x32xf32>, vector<16x32xf32> -> vector<16x32xf32>
    %c0_87 = arith.constant 0 : index
    %c0_88 = arith.constant 0 : index
    %c0_89 = arith.constant 0 : index
    %231 = vector.load %arg13[%c0_87, %c0_88, %c0_89] : memref<2x1x32xf32, #tpu.memory_space<vmem>>, vector<1x1x32xf32>
    %232 = vector.shape_cast %231 : vector<1x1x32xf32> to vector<1x32xf32>
    %233 = vector.broadcast %232 : vector<1x32xf32> to vector<16x32xf32>
    %234 = arith.addf %230, %233 : vector<16x32xf32>
    %235 = arith.addf %154, %234 : vector<16x32xf32>
    %c1 = arith.constant 1 : index
    %c0_90 = arith.constant 0 : index
    %c0_91 = arith.constant 0 : index
    %236 = vector.load %arg2[%c1, %c0_90, %c0_91] : memref<2x1x32xf32, #tpu.memory_space<vmem>>, vector<1x1x32xf32>
    %237 = vector.shape_cast %236 : vector<1x1x32xf32> to vector<1x32xf32>
    %c1_92 = arith.constant 1 : index
    %c0_93 = arith.constant 0 : index
    %c0_94 = arith.constant 0 : index
    %238 = vector.load %arg3[%c1_92, %c0_93, %c0_94] : memref<2x1x32xf32, #tpu.memory_space<vmem>>, vector<1x1x32xf32>
    %239 = vector.shape_cast %238 : vector<1x1x32xf32> to vector<1x32xf32>
    %cst_95 = arith.constant dense<0.000000e+00> : vector<16xf32>
    %240 = vector.multi_reduction <add>, %235, %cst_95 [1] : vector<16x32xf32> to vector<16xf32>
    %241 = vector.shape_cast %240 : vector<16xf32> to vector<16x1xf32>
    %cst_96 = arith.constant 3.200000e+01 : f32
    %242 = vector.broadcast %cst_96 : f32 to vector<16x1xf32>
    %243 = arith.divf %241, %242 : vector<16x1xf32>
    %244 = vector.broadcast %243 : vector<16x1xf32> to vector<16x32xf32>
    %245 = arith.subf %235, %244 : vector<16x32xf32>
    %246 = arith.mulf %245, %245 : vector<16x32xf32>
    %cst_97 = arith.constant dense<0.000000e+00> : vector<16xf32>
    %247 = vector.multi_reduction <add>, %246, %cst_97 [1] : vector<16x32xf32> to vector<16xf32>
    %248 = vector.shape_cast %247 : vector<16xf32> to vector<16x1xf32>
    %cst_98 = arith.constant 3.200000e+01 : f32
    %249 = vector.broadcast %cst_98 : f32 to vector<16x1xf32>
    %250 = arith.divf %248, %249 : vector<16x1xf32>
    %251 = vector.broadcast %243 : vector<16x1xf32> to vector<16x32xf32>
    %252 = arith.subf %235, %251 : vector<16x32xf32>
    %cst_99 = arith.constant 9.99999974E-6 : f32
    %253 = vector.broadcast %cst_99 : f32 to vector<16x1xf32>
    %254 = arith.addf %250, %253 : vector<16x1xf32>
    %255 = math.rsqrt %254 : vector<16x1xf32>
    %256 = vector.broadcast %255 : vector<16x1xf32> to vector<16x32xf32>
    %257 = arith.mulf %252, %256 : vector<16x32xf32>
    %258 = vector.broadcast %237 : vector<1x32xf32> to vector<16x32xf32>
    %259 = arith.mulf %257, %258 : vector<16x32xf32>
    %260 = vector.broadcast %239 : vector<1x32xf32> to vector<16x32xf32>
    %261 = arith.addf %259, %260 : vector<16x32xf32>
    %c1_100 = arith.constant 1 : index
    %c0_101 = arith.constant 0 : index
    %c0_102 = arith.constant 0 : index
    %262 = vector.load %arg4[%c1_100, %c0_101, %c0_102] : memref<2x32x96xf32, #tpu.memory_space<vmem>>, vector<1x32x96xf32>
    %263 = vector.shape_cast %262 : vector<1x32x96xf32> to vector<32x96xf32>
    %cst_103 = arith.constant dense<0.000000e+00> : vector<16x96xf32>
    %264 = tpu.matmul %261, %263, %cst_103 {dimension_numbers = #tpu.dot_dimension_numbers<[1], [0], [0], [1], [0, 0, 1, 1], [], []>} : vector<16x32xf32>, vector<32x96xf32>, vector<16x96xf32> -> vector<16x96xf32>
    %c1_104 = arith.constant 1 : index
    %c0_105 = arith.constant 0 : index
    %c0_106 = arith.constant 0 : index
    %265 = vector.load %arg5[%c1_104, %c0_105, %c0_106] : memref<2x1x96xf32, #tpu.memory_space<vmem>>, vector<1x1x96xf32>
    %266 = vector.shape_cast %265 : vector<1x1x96xf32> to vector<1x96xf32>
    %267 = vector.broadcast %266 : vector<1x96xf32> to vector<16x96xf32>
    %268 = arith.addf %264, %267 : vector<16x96xf32>
    %269 = vector.extract_strided_slice %268 {offsets = [0, 0], sizes = [16, 32], strides = [1, 1]} : vector<16x96xf32> to vector<16x32xf32>
    %cst_107 = arith.constant 0.353553385 : f32
    %270 = vector.broadcast %cst_107 : f32 to vector<16x32xf32>
    %271 = arith.mulf %269, %270 : vector<16x32xf32>
    %272 = vector.extract_strided_slice %268 {offsets = [0, 32], sizes = [16, 32], strides = [1, 1]} : vector<16x96xf32> to vector<16x32xf32>
    %273 = vector.extract_strided_slice %268 {offsets = [0, 64], sizes = [16, 32], strides = [1, 1]} : vector<16x96xf32> to vector<16x32xf32>
    %c1_108 = arith.constant 1 : index
    %c0_109 = arith.constant 0 : index
    %c0_110 = arith.constant 0 : index
    %274 = vector.load %arg6[%c1_108, %c0_109, %c0_110] : memref<2x32x32xf32, #tpu.memory_space<vmem>>, vector<1x32x32xf32>
    %275 = vector.shape_cast %274 : vector<1x32x32xf32> to vector<32x32xf32>
    %cst_111 = arith.constant 0.000000e+00 : f32
    %276 = vector.broadcast %cst_111 : f32 to vector<16x32xf32>
    %277 = vector.extract_strided_slice %271 {offsets = [0, 0], sizes = [16, 8], strides = [1, 1]} : vector<16x32xf32> to vector<16x8xf32>
    %278 = vector.shape_cast %277 : vector<16x8xf32> to vector<2x8x8xf32>
    %279 = vector.extract_strided_slice %272 {offsets = [0, 0], sizes = [16, 8], strides = [1, 1]} : vector<16x32xf32> to vector<16x8xf32>
    %280 = vector.shape_cast %279 : vector<16x8xf32> to vector<2x8x8xf32>
    %281 = vector.extract_strided_slice %273 {offsets = [0, 0], sizes = [16, 8], strides = [1, 1]} : vector<16x32xf32> to vector<16x8xf32>
    %282 = vector.shape_cast %281 : vector<16x8xf32> to vector<2x8x8xf32>
    "tpu.trace_start"() <{level = 10 : i32, message = "btd,bsd->bts"}> : () -> ()
    %cst_112 = arith.constant dense<0.000000e+00> : vector<2x8x8xf32>
    %283 = tpu.matmul %278, %280, %cst_112 {dimension_numbers = #tpu.dot_dimension_numbers<[2], [2], [1], [1], [0, 0, 0, 1, 1, 1], [0], [0]>} : vector<2x8x8xf32>, vector<2x8x8xf32>, vector<2x8x8xf32> -> vector<2x8x8xf32>
    %cst_113 = arith.constant 0xFF800000 : f32
    "tpu.trace_stop"() : () -> ()
    %284 = vector.shape_cast %4 : vector<1x8x8xi1> to vector<1x8x8xi1>
    %285 = vector.broadcast %284 : vector<1x8x8xi1> to vector<2x8x8xi1>
    %286 = vector.broadcast %cst_113 : f32 to vector<2x8x8xf32>
    %287 = arith.select %285, %286, %283 : vector<2x8x8xi1>, vector<2x8x8xf32>
    %cst_114 = arith.constant dense<0xFF800000> : vector<2x8xf32>
    %288 = vector.multi_reduction <maximumf>, %287, %cst_114 [2] : vector<2x8x8xf32> to vector<2x8xf32>
    %289 = vector.shape_cast %288 : vector<2x8xf32> to vector<2x8x1xf32>
    %290 = vector.broadcast %289 : vector<2x8x1xf32> to vector<2x8x8xf32>
    %291 = arith.subf %287, %290 : vector<2x8x8xf32>
    %292 = math.exp %291 : vector<2x8x8xf32>
    %cst_115 = arith.constant dense<0.000000e+00> : vector<2x8xf32>
    %293 = vector.multi_reduction <add>, %292, %cst_115 [2] : vector<2x8x8xf32> to vector<2x8xf32>
    %294 = vector.shape_cast %293 : vector<2x8xf32> to vector<2x8x1xf32>
    %295 = tpu.reciprocal %294 {approx = true} : vector<2x8x1xf32> -> vector<2x8x1xf32>
    %296 = vector.broadcast %295 : vector<2x8x1xf32> to vector<2x8x8xf32>
    %297 = arith.mulf %292, %296 : vector<2x8x8xf32>
    "tpu.trace_start"() <{level = 10 : i32, message = "bts,bsd->btd"}> : () -> ()
    %cst_116 = arith.constant dense<0.000000e+00> : vector<2x8x8xf32>
    %298 = tpu.matmul %297, %282, %cst_116 {dimension_numbers = #tpu.dot_dimension_numbers<[2], [1], [1], [2], [0, 0, 0, 1, 1, 2], [0], [0]>} : vector<2x8x8xf32>, vector<2x8x8xf32>, vector<2x8x8xf32> -> vector<2x8x8xf32>
    "tpu.trace_stop"() : () -> ()
    %299 = vector.shape_cast %298 : vector<2x8x8xf32> to vector<16x8xf32>
    %300 = vector.extract_strided_slice %275 {offsets = [0, 0], sizes = [8, 32], strides = [1, 1]} : vector<32x32xf32> to vector<8x32xf32>
    %cst_117 = arith.constant dense<0.000000e+00> : vector<16x32xf32>
    %301 = tpu.matmul %299, %300, %cst_117 {dimension_numbers = #tpu.dot_dimension_numbers<[1], [0], [0], [1], [0, 0, 1, 1], [], []>} : vector<16x8xf32>, vector<8x32xf32>, vector<16x32xf32> -> vector<16x32xf32>
    %302 = arith.addf %276, %301 : vector<16x32xf32>
    %303 = vector.extract_strided_slice %271 {offsets = [0, 8], sizes = [16, 8], strides = [1, 1]} : vector<16x32xf32> to vector<16x8xf32>
    %304 = vector.shape_cast %303 : vector<16x8xf32> to vector<2x8x8xf32>
    %305 = vector.extract_strided_slice %272 {offsets = [0, 8], sizes = [16, 8], strides = [1, 1]} : vector<16x32xf32> to vector<16x8xf32>
    %306 = vector.shape_cast %305 : vector<16x8xf32> to vector<2x8x8xf32>
    %307 = vector.extract_strided_slice %273 {offsets = [0, 8], sizes = [16, 8], strides = [1, 1]} : vector<16x32xf32> to vector<16x8xf32>
    %308 = vector.shape_cast %307 : vector<16x8xf32> to vector<2x8x8xf32>
    "tpu.trace_start"() <{level = 10 : i32, message = "btd,bsd->bts"}> : () -> ()
    %cst_118 = arith.constant dense<0.000000e+00> : vector<2x8x8xf32>
    %309 = tpu.matmul %304, %306, %cst_118 {dimension_numbers = #tpu.dot_dimension_numbers<[2], [2], [1], [1], [0, 0, 0, 1, 1, 1], [0], [0]>} : vector<2x8x8xf32>, vector<2x8x8xf32>, vector<2x8x8xf32> -> vector<2x8x8xf32>
    %cst_119 = arith.constant 0xFF800000 : f32
    "tpu.trace_stop"() : () -> ()
    %310 = vector.shape_cast %4 : vector<1x8x8xi1> to vector<1x8x8xi1>
    %311 = vector.broadcast %310 : vector<1x8x8xi1> to vector<2x8x8xi1>
    %312 = vector.broadcast %cst_119 : f32 to vector<2x8x8xf32>
    %313 = arith.select %311, %312, %309 : vector<2x8x8xi1>, vector<2x8x8xf32>
    %cst_120 = arith.constant dense<0xFF800000> : vector<2x8xf32>
    %314 = vector.multi_reduction <maximumf>, %313, %cst_120 [2] : vector<2x8x8xf32> to vector<2x8xf32>
    %315 = vector.shape_cast %314 : vector<2x8xf32> to vector<2x8x1xf32>
    %316 = vector.broadcast %315 : vector<2x8x1xf32> to vector<2x8x8xf32>
    %317 = arith.subf %313, %316 : vector<2x8x8xf32>
    %318 = math.exp %317 : vector<2x8x8xf32>
    %cst_121 = arith.constant dense<0.000000e+00> : vector<2x8xf32>
    %319 = vector.multi_reduction <add>, %318, %cst_121 [2] : vector<2x8x8xf32> to vector<2x8xf32>
    %320 = vector.shape_cast %319 : vector<2x8xf32> to vector<2x8x1xf32>
    %321 = tpu.reciprocal %320 {approx = true} : vector<2x8x1xf32> -> vector<2x8x1xf32>
    %322 = vector.broadcast %321 : vector<2x8x1xf32> to vector<2x8x8xf32>
    %323 = arith.mulf %318, %322 : vector<2x8x8xf32>
    "tpu.trace_start"() <{level = 10 : i32, message = "bts,bsd->btd"}> : () -> ()
    %cst_122 = arith.constant dense<0.000000e+00> : vector<2x8x8xf32>
    %324 = tpu.matmul %323, %308, %cst_122 {dimension_numbers = #tpu.dot_dimension_numbers<[2], [1], [1], [2], [0, 0, 0, 1, 1, 2], [0], [0]>} : vector<2x8x8xf32>, vector<2x8x8xf32>, vector<2x8x8xf32> -> vector<2x8x8xf32>
    "tpu.trace_stop"() : () -> ()
    %325 = vector.shape_cast %324 : vector<2x8x8xf32> to vector<16x8xf32>
    %326 = vector.extract_strided_slice %275 {offsets = [8, 0], sizes = [8, 32], strides = [1, 1]} : vector<32x32xf32> to vector<8x32xf32>
    %cst_123 = arith.constant dense<0.000000e+00> : vector<16x32xf32>
    %327 = tpu.matmul %325, %326, %cst_123 {dimension_numbers = #tpu.dot_dimension_numbers<[1], [0], [0], [1], [0, 0, 1, 1], [], []>} : vector<16x8xf32>, vector<8x32xf32>, vector<16x32xf32> -> vector<16x32xf32>
    %328 = arith.addf %302, %327 : vector<16x32xf32>
    %329 = vector.extract_strided_slice %271 {offsets = [0, 16], sizes = [16, 8], strides = [1, 1]} : vector<16x32xf32> to vector<16x8xf32>
    %330 = vector.shape_cast %329 : vector<16x8xf32> to vector<2x8x8xf32>
    %331 = vector.extract_strided_slice %272 {offsets = [0, 16], sizes = [16, 8], strides = [1, 1]} : vector<16x32xf32> to vector<16x8xf32>
    %332 = vector.shape_cast %331 : vector<16x8xf32> to vector<2x8x8xf32>
    %333 = vector.extract_strided_slice %273 {offsets = [0, 16], sizes = [16, 8], strides = [1, 1]} : vector<16x32xf32> to vector<16x8xf32>
    %334 = vector.shape_cast %333 : vector<16x8xf32> to vector<2x8x8xf32>
    "tpu.trace_start"() <{level = 10 : i32, message = "btd,bsd->bts"}> : () -> ()
    %cst_124 = arith.constant dense<0.000000e+00> : vector<2x8x8xf32>
    %335 = tpu.matmul %330, %332, %cst_124 {dimension_numbers = #tpu.dot_dimension_numbers<[2], [2], [1], [1], [0, 0, 0, 1, 1, 1], [0], [0]>} : vector<2x8x8xf32>, vector<2x8x8xf32>, vector<2x8x8xf32> -> vector<2x8x8xf32>
    %cst_125 = arith.constant 0xFF800000 : f32
    "tpu.trace_stop"() : () -> ()
    %336 = vector.shape_cast %4 : vector<1x8x8xi1> to vector<1x8x8xi1>
    %337 = vector.broadcast %336 : vector<1x8x8xi1> to vector<2x8x8xi1>
    %338 = vector.broadcast %cst_125 : f32 to vector<2x8x8xf32>
    %339 = arith.select %337, %338, %335 : vector<2x8x8xi1>, vector<2x8x8xf32>
    %cst_126 = arith.constant dense<0xFF800000> : vector<2x8xf32>
    %340 = vector.multi_reduction <maximumf>, %339, %cst_126 [2] : vector<2x8x8xf32> to vector<2x8xf32>
    %341 = vector.shape_cast %340 : vector<2x8xf32> to vector<2x8x1xf32>
    %342 = vector.broadcast %341 : vector<2x8x1xf32> to vector<2x8x8xf32>
    %343 = arith.subf %339, %342 : vector<2x8x8xf32>
    %344 = math.exp %343 : vector<2x8x8xf32>
    %cst_127 = arith.constant dense<0.000000e+00> : vector<2x8xf32>
    %345 = vector.multi_reduction <add>, %344, %cst_127 [2] : vector<2x8x8xf32> to vector<2x8xf32>
    %346 = vector.shape_cast %345 : vector<2x8xf32> to vector<2x8x1xf32>
    %347 = tpu.reciprocal %346 {approx = true} : vector<2x8x1xf32> -> vector<2x8x1xf32>
    %348 = vector.broadcast %347 : vector<2x8x1xf32> to vector<2x8x8xf32>
    %349 = arith.mulf %344, %348 : vector<2x8x8xf32>
    "tpu.trace_start"() <{level = 10 : i32, message = "bts,bsd->btd"}> : () -> ()
    %cst_128 = arith.constant dense<0.000000e+00> : vector<2x8x8xf32>
    %350 = tpu.matmul %349, %334, %cst_128 {dimension_numbers = #tpu.dot_dimension_numbers<[2], [1], [1], [2], [0, 0, 0, 1, 1, 2], [0], [0]>} : vector<2x8x8xf32>, vector<2x8x8xf32>, vector<2x8x8xf32> -> vector<2x8x8xf32>
    "tpu.trace_stop"() : () -> ()
    %351 = vector.shape_cast %350 : vector<2x8x8xf32> to vector<16x8xf32>
    %352 = vector.extract_strided_slice %275 {offsets = [16, 0], sizes = [8, 32], strides = [1, 1]} : vector<32x32xf32> to vector<8x32xf32>
    %cst_129 = arith.constant dense<0.000000e+00> : vector<16x32xf32>
    %353 = tpu.matmul %351, %352, %cst_129 {dimension_numbers = #tpu.dot_dimension_numbers<[1], [0], [0], [1], [0, 0, 1, 1], [], []>} : vector<16x8xf32>, vector<8x32xf32>, vector<16x32xf32> -> vector<16x32xf32>
    %354 = arith.addf %328, %353 : vector<16x32xf32>
    %355 = vector.extract_strided_slice %271 {offsets = [0, 24], sizes = [16, 8], strides = [1, 1]} : vector<16x32xf32> to vector<16x8xf32>
    %356 = vector.shape_cast %355 : vector<16x8xf32> to vector<2x8x8xf32>
    %357 = vector.extract_strided_slice %272 {offsets = [0, 24], sizes = [16, 8], strides = [1, 1]} : vector<16x32xf32> to vector<16x8xf32>
    %358 = vector.shape_cast %357 : vector<16x8xf32> to vector<2x8x8xf32>
    %359 = vector.extract_strided_slice %273 {offsets = [0, 24], sizes = [16, 8], strides = [1, 1]} : vector<16x32xf32> to vector<16x8xf32>
    %360 = vector.shape_cast %359 : vector<16x8xf32> to vector<2x8x8xf32>
    "tpu.trace_start"() <{level = 10 : i32, message = "btd,bsd->bts"}> : () -> ()
    %cst_130 = arith.constant dense<0.000000e+00> : vector<2x8x8xf32>
    %361 = tpu.matmul %356, %358, %cst_130 {dimension_numbers = #tpu.dot_dimension_numbers<[2], [2], [1], [1], [0, 0, 0, 1, 1, 1], [0], [0]>} : vector<2x8x8xf32>, vector<2x8x8xf32>, vector<2x8x8xf32> -> vector<2x8x8xf32>
    %cst_131 = arith.constant 0xFF800000 : f32
    "tpu.trace_stop"() : () -> ()
    %362 = vector.shape_cast %4 : vector<1x8x8xi1> to vector<1x8x8xi1>
    %363 = vector.broadcast %362 : vector<1x8x8xi1> to vector<2x8x8xi1>
    %364 = vector.broadcast %cst_131 : f32 to vector<2x8x8xf32>
    %365 = arith.select %363, %364, %361 : vector<2x8x8xi1>, vector<2x8x8xf32>
    %cst_132 = arith.constant dense<0xFF800000> : vector<2x8xf32>
    %366 = vector.multi_reduction <maximumf>, %365, %cst_132 [2] : vector<2x8x8xf32> to vector<2x8xf32>
    %367 = vector.shape_cast %366 : vector<2x8xf32> to vector<2x8x1xf32>
    %368 = vector.broadcast %367 : vector<2x8x1xf32> to vector<2x8x8xf32>
    %369 = arith.subf %365, %368 : vector<2x8x8xf32>
    %370 = math.exp %369 : vector<2x8x8xf32>
    %cst_133 = arith.constant dense<0.000000e+00> : vector<2x8xf32>
    %371 = vector.multi_reduction <add>, %370, %cst_133 [2] : vector<2x8x8xf32> to vector<2x8xf32>
    %372 = vector.shape_cast %371 : vector<2x8xf32> to vector<2x8x1xf32>
    %373 = tpu.reciprocal %372 {approx = true} : vector<2x8x1xf32> -> vector<2x8x1xf32>
    %374 = vector.broadcast %373 : vector<2x8x1xf32> to vector<2x8x8xf32>
    %375 = arith.mulf %370, %374 : vector<2x8x8xf32>
    "tpu.trace_start"() <{level = 10 : i32, message = "bts,bsd->btd"}> : () -> ()
    %cst_134 = arith.constant dense<0.000000e+00> : vector<2x8x8xf32>
    %376 = tpu.matmul %375, %360, %cst_134 {dimension_numbers = #tpu.dot_dimension_numbers<[2], [1], [1], [2], [0, 0, 0, 1, 1, 2], [0], [0]>} : vector<2x8x8xf32>, vector<2x8x8xf32>, vector<2x8x8xf32> -> vector<2x8x8xf32>
    "tpu.trace_stop"() : () -> ()
    %377 = vector.shape_cast %376 : vector<2x8x8xf32> to vector<16x8xf32>
    %378 = vector.extract_strided_slice %275 {offsets = [24, 0], sizes = [8, 32], strides = [1, 1]} : vector<32x32xf32> to vector<8x32xf32>
    %cst_135 = arith.constant dense<0.000000e+00> : vector<16x32xf32>
    %379 = tpu.matmul %377, %378, %cst_135 {dimension_numbers = #tpu.dot_dimension_numbers<[1], [0], [0], [1], [0, 0, 1, 1], [], []>} : vector<16x8xf32>, vector<8x32xf32>, vector<16x32xf32> -> vector<16x32xf32>
    %380 = arith.addf %354, %379 : vector<16x32xf32>
    %381 = arith.addf %235, %380 : vector<16x32xf32>
    %c1_136 = arith.constant 1 : index
    %c0_137 = arith.constant 0 : index
    %c0_138 = arith.constant 0 : index
    %382 = vector.load %arg7[%c1_136, %c0_137, %c0_138] : memref<2x1x32xf32, #tpu.memory_space<vmem>>, vector<1x1x32xf32>
    %383 = vector.shape_cast %382 : vector<1x1x32xf32> to vector<1x32xf32>
    %384 = vector.broadcast %383 : vector<1x32xf32> to vector<16x32xf32>
    %385 = arith.addf %381, %384 : vector<16x32xf32>
    %c1_139 = arith.constant 1 : index
    %c0_140 = arith.constant 0 : index
    %c0_141 = arith.constant 0 : index
    %386 = vector.load %arg8[%c1_139, %c0_140, %c0_141] : memref<2x1x32xf32, #tpu.memory_space<vmem>>, vector<1x1x32xf32>
    %387 = vector.shape_cast %386 : vector<1x1x32xf32> to vector<1x32xf32>
    %c1_142 = arith.constant 1 : index
    %c0_143 = arith.constant 0 : index
    %c0_144 = arith.constant 0 : index
    %388 = vector.load %arg9[%c1_142, %c0_143, %c0_144] : memref<2x1x32xf32, #tpu.memory_space<vmem>>, vector<1x1x32xf32>
    %389 = vector.shape_cast %388 : vector<1x1x32xf32> to vector<1x32xf32>
    %cst_145 = arith.constant dense<0.000000e+00> : vector<16xf32>
    %390 = vector.multi_reduction <add>, %385, %cst_145 [1] : vector<16x32xf32> to vector<16xf32>
    %391 = vector.shape_cast %390 : vector<16xf32> to vector<16x1xf32>
    %cst_146 = arith.constant 3.200000e+01 : f32
    %392 = vector.broadcast %cst_146 : f32 to vector<16x1xf32>
    %393 = arith.divf %391, %392 : vector<16x1xf32>
    %394 = vector.broadcast %393 : vector<16x1xf32> to vector<16x32xf32>
    %395 = arith.subf %385, %394 : vector<16x32xf32>
    %396 = arith.mulf %395, %395 : vector<16x32xf32>
    %cst_147 = arith.constant dense<0.000000e+00> : vector<16xf32>
    %397 = vector.multi_reduction <add>, %396, %cst_147 [1] : vector<16x32xf32> to vector<16xf32>
    %398 = vector.shape_cast %397 : vector<16xf32> to vector<16x1xf32>
    %cst_148 = arith.constant 3.200000e+01 : f32
    %399 = vector.broadcast %cst_148 : f32 to vector<16x1xf32>
    %400 = arith.divf %398, %399 : vector<16x1xf32>
    %401 = vector.broadcast %393 : vector<16x1xf32> to vector<16x32xf32>
    %402 = arith.subf %385, %401 : vector<16x32xf32>
    %cst_149 = arith.constant 9.99999974E-6 : f32
    %403 = vector.broadcast %cst_149 : f32 to vector<16x1xf32>
    %404 = arith.addf %400, %403 : vector<16x1xf32>
    %405 = math.rsqrt %404 : vector<16x1xf32>
    %406 = vector.broadcast %405 : vector<16x1xf32> to vector<16x32xf32>
    %407 = arith.mulf %402, %406 : vector<16x32xf32>
    %408 = vector.broadcast %387 : vector<1x32xf32> to vector<16x32xf32>
    %409 = arith.mulf %407, %408 : vector<16x32xf32>
    %410 = vector.broadcast %389 : vector<1x32xf32> to vector<16x32xf32>
    %411 = arith.addf %409, %410 : vector<16x32xf32>
    %c1_150 = arith.constant 1 : index
    %c0_151 = arith.constant 0 : index
    %c0_152 = arith.constant 0 : index
    %412 = vector.load %arg10[%c1_150, %c0_151, %c0_152] : memref<2x32x64xf32, #tpu.memory_space<vmem>>, vector<1x32x64xf32>
    %413 = vector.shape_cast %412 : vector<1x32x64xf32> to vector<32x64xf32>
    %cst_153 = arith.constant dense<0.000000e+00> : vector<16x64xf32>
    %414 = tpu.matmul %411, %413, %cst_153 {dimension_numbers = #tpu.dot_dimension_numbers<[1], [0], [0], [1], [0, 0, 1, 1], [], []>} : vector<16x32xf32>, vector<32x64xf32>, vector<16x64xf32> -> vector<16x64xf32>
    %c1_154 = arith.constant 1 : index
    %c0_155 = arith.constant 0 : index
    %c0_156 = arith.constant 0 : index
    %415 = vector.load %arg11[%c1_154, %c0_155, %c0_156] : memref<2x1x64xf32, #tpu.memory_space<vmem>>, vector<1x1x64xf32>
    %416 = vector.shape_cast %415 : vector<1x1x64xf32> to vector<1x64xf32>
    %417 = vector.broadcast %416 : vector<1x64xf32> to vector<16x64xf32>
    %418 = arith.addf %414, %417 : vector<16x64xf32>
    %cst_157 = arith.constant 5.000000e-01 : f32
    %419 = vector.broadcast %cst_157 : f32 to vector<16x64xf32>
    %420 = arith.mulf %419, %418 : vector<16x64xf32>
    %cst_158 = arith.constant 0.707106769 : f32
    %421 = vector.broadcast %cst_158 : f32 to vector<16x64xf32>
    %422 = arith.mulf %418, %421 : vector<16x64xf32>
    %423 = math.absf %422 : vector<16x64xf32>
    %cst_159 = arith.constant 0.327591091 : f32
    %424 = vector.broadcast %cst_159 : f32 to vector<16x64xf32>
    %425 = arith.mulf %424, %423 : vector<16x64xf32>
    %cst_160 = arith.constant 1.000000e+00 : f32
    %426 = vector.broadcast %cst_160 : f32 to vector<16x64xf32>
    %427 = arith.addf %426, %425 : vector<16x64xf32>
    %cst_161 = arith.constant 1.000000e+00 : f32
    %428 = vector.broadcast %cst_161 : f32 to vector<16x64xf32>
    %429 = arith.divf %428, %427 : vector<16x64xf32>
    %cst_162 = arith.constant 1.06140542 : f32
    %430 = vector.broadcast %cst_162 : f32 to vector<16x64xf32>
    %431 = arith.mulf %430, %429 : vector<16x64xf32>
    %cst_163 = arith.constant -1.45315206 : f32
    %432 = vector.broadcast %cst_163 : f32 to vector<16x64xf32>
    %433 = arith.addf %431, %432 : vector<16x64xf32>
    %434 = arith.mulf %433, %429 : vector<16x64xf32>
    %cst_164 = arith.constant 1.42141378 : f32
    %435 = vector.broadcast %cst_164 : f32 to vector<16x64xf32>
    %436 = arith.addf %434, %435 : vector<16x64xf32>
    %437 = arith.mulf %436, %429 : vector<16x64xf32>
    %cst_165 = arith.constant -0.284496725 : f32
    %438 = vector.broadcast %cst_165 : f32 to vector<16x64xf32>
    %439 = arith.addf %437, %438 : vector<16x64xf32>
    %440 = arith.mulf %439, %429 : vector<16x64xf32>
    %cst_166 = arith.constant 0.254829586 : f32
    %441 = vector.broadcast %cst_166 : f32 to vector<16x64xf32>
    %442 = arith.addf %440, %441 : vector<16x64xf32>
    %443 = arith.mulf %442, %429 : vector<16x64xf32>
    %cst_167 = arith.constant 0.000000e+00 : f32
    %444 = vector.broadcast %cst_167 : f32 to vector<16x64xf32>
    %445 = arith.subf %444, %423 : vector<16x64xf32>
    %446 = arith.mulf %445, %423 : vector<16x64xf32>
    %447 = math.exp %446 : vector<16x64xf32>
    %448 = arith.mulf %443, %447 : vector<16x64xf32>
    %cst_168 = arith.constant 1.000000e+00 : f32
    %449 = vector.broadcast %cst_168 : f32 to vector<16x64xf32>
    %450 = arith.subf %449, %448 : vector<16x64xf32>
    %cst_169 = arith.constant 0.000000e+00 : f32
    %451 = vector.broadcast %cst_169 : f32 to vector<16x64xf32>
    %452 = arith.cmpf oge, %422, %451 : vector<16x64xf32>
    %cst_170 = arith.constant 0.000000e+00 : f32
    %453 = vector.broadcast %cst_170 : f32 to vector<16x64xf32>
    %454 = arith.subf %453, %450 : vector<16x64xf32>
    %455 = arith.select %452, %450, %454 : vector<16x64xi1>, vector<16x64xf32>
    %cst_171 = arith.constant 1.000000e+00 : f32
    %456 = vector.broadcast %cst_171 : f32 to vector<16x64xf32>
    %457 = arith.addf %456, %455 : vector<16x64xf32>
    %458 = arith.mulf %420, %457 : vector<16x64xf32>
    %c1_172 = arith.constant 1 : index
    %c0_173 = arith.constant 0 : index
    %c0_174 = arith.constant 0 : index
    %459 = vector.load %arg12[%c1_172, %c0_173, %c0_174] : memref<2x64x32xf32, #tpu.memory_space<vmem>>, vector<1x64x32xf32>
    %460 = vector.shape_cast %459 : vector<1x64x32xf32> to vector<64x32xf32>
    %cst_175 = arith.constant dense<0.000000e+00> : vector<16x32xf32>
    %461 = tpu.matmul %458, %460, %cst_175 {dimension_numbers = #tpu.dot_dimension_numbers<[1], [0], [0], [1], [0, 0, 1, 1], [], []>} : vector<16x64xf32>, vector<64x32xf32>, vector<16x32xf32> -> vector<16x32xf32>
    %c1_176 = arith.constant 1 : index
    %c0_177 = arith.constant 0 : index
    %c0_178 = arith.constant 0 : index
    %462 = vector.load %arg13[%c1_176, %c0_177, %c0_178] : memref<2x1x32xf32, #tpu.memory_space<vmem>>, vector<1x1x32xf32>
    %463 = vector.shape_cast %462 : vector<1x1x32xf32> to vector<1x32xf32>
    %464 = vector.broadcast %463 : vector<1x32xf32> to vector<16x32xf32>
    %465 = arith.addf %461, %464 : vector<16x32xf32>
    %466 = arith.addf %385, %465 : vector<16x32xf32>
    %c0_179 = arith.constant 0 : index
    %c0_180 = arith.constant 0 : index
    %467 = vector.load %arg14[%c0_179, %c0_180] : memref<1x32xf32, #tpu.memory_space<vmem>>, vector<1x32xf32>
    %c0_181 = arith.constant 0 : index
    %c0_182 = arith.constant 0 : index
    %468 = vector.load %arg15[%c0_181, %c0_182] : memref<1x32xf32, #tpu.memory_space<vmem>>, vector<1x32xf32>
    %cst_183 = arith.constant dense<0.000000e+00> : vector<16xf32>
    %469 = vector.multi_reduction <add>, %466, %cst_183 [1] : vector<16x32xf32> to vector<16xf32>
    %470 = vector.shape_cast %469 : vector<16xf32> to vector<16x1xf32>
    %cst_184 = arith.constant 3.200000e+01 : f32
    %471 = vector.broadcast %cst_184 : f32 to vector<16x1xf32>
    %472 = arith.divf %470, %471 : vector<16x1xf32>
    %473 = vector.broadcast %472 : vector<16x1xf32> to vector<16x32xf32>
    %474 = arith.subf %466, %473 : vector<16x32xf32>
    %475 = arith.mulf %474, %474 : vector<16x32xf32>
    %cst_185 = arith.constant dense<0.000000e+00> : vector<16xf32>
    %476 = vector.multi_reduction <add>, %475, %cst_185 [1] : vector<16x32xf32> to vector<16xf32>
    %477 = vector.shape_cast %476 : vector<16xf32> to vector<16x1xf32>
    %cst_186 = arith.constant 3.200000e+01 : f32
    %478 = vector.broadcast %cst_186 : f32 to vector<16x1xf32>
    %479 = arith.divf %477, %478 : vector<16x1xf32>
    %480 = vector.broadcast %472 : vector<16x1xf32> to vector<16x32xf32>
    %481 = arith.subf %466, %480 : vector<16x32xf32>
    %cst_187 = arith.constant 9.99999974E-6 : f32
    %482 = vector.broadcast %cst_187 : f32 to vector<16x1xf32>
    %483 = arith.addf %479, %482 : vector<16x1xf32>
    %484 = math.rsqrt %483 : vector<16x1xf32>
    %485 = vector.broadcast %484 : vector<16x1xf32> to vector<16x32xf32>
    %486 = arith.mulf %481, %485 : vector<16x32xf32>
    %487 = vector.broadcast %467 : vector<1x32xf32> to vector<16x32xf32>
    %488 = arith.mulf %486, %487 : vector<16x32xf32>
    %489 = vector.broadcast %468 : vector<1x32xf32> to vector<16x32xf32>
    %490 = arith.addf %488, %489 : vector<16x32xf32>
    %c0_188 = arith.constant 0 : index
    %c0_189 = arith.constant 0 : index
    %491 = vector.load %arg16[%c0_188, %c0_189] : memref<128x32xf32, #tpu.memory_space<vmem>>, vector<128x32xf32>
    %cst_190 = arith.constant dense<0.000000e+00> : vector<16x128xf32>
    %492 = tpu.matmul %490, %491, %cst_190 {dimension_numbers = #tpu.dot_dimension_numbers<[1], [1], [0], [0], [0, 0, 1, 0], [], []>} : vector<16x32xf32>, vector<128x32xf32>, vector<16x128xf32> -> vector<16x128xf32>
    %c0_191 = arith.constant 0 : index
    %c0_192 = arith.constant 0 : index
    %493 = vector.load %arg17[%c0_191, %c0_192] : memref<1x128xf32, #tpu.memory_space<vmem>>, vector<1x128xf32>
    %494 = vector.broadcast %493 : vector<1x128xf32> to vector<16x128xf32>
    %495 = arith.addf %492, %494 : vector<16x128xf32>
    %c0_193 = arith.constant 0 : index
    %c0_194 = arith.constant 0 : index
    %496 = vector.load %arg18[%c0_193, %c0_194] : memref<16x128xf32, #tpu.memory_space<vmem>>, vector<16x128xf32>
    tpu.vector_store %arg18[%c0_193, %c0_194], %495 {strides = array<i32>} : memref<16x128xf32, #tpu.memory_space<vmem>>, vector<16x128xf32>,
    return
  }
  func.func @transform_0(%arg0: i32) -> (i32, i32) {
    %c0_i32 = arith.constant 0 : i32
    %c0_i32_0 = arith.constant 0 : i32
    %c0_i32_1 = arith.constant 0 : i32
    return %c0_i32, %c0_i32_0 : i32, i32
  }
  func.func @transform_1(%arg0: i32) -> (i32, i32, i32) {
    %c0_i32 = arith.constant 0 : i32
    %c0_i32_0 = arith.constant 0 : i32
    %c0_i32_1 = arith.constant 0 : i32
    %c0_i32_2 = arith.constant 0 : i32
    return %c0_i32, %c0_i32_0, %c0_i32_1 : i32, i32, i32
  }
  func.func @transform_2(%arg0: i32) -> (i32, i32, i32) {
    %c0_i32 = arith.constant 0 : i32
    %c0_i32_0 = arith.constant 0 : i32
    %c0_i32_1 = arith.constant 0 : i32
    %c0_i32_2 = arith.constant 0 : i32
    return %c0_i32, %c0_i32_0, %c0_i32_1 : i32, i32, i32
  }
  func.func @transform_3(%arg0: i32) -> (i32, i32, i32) {
    %c0_i32 = arith.constant 0 : i32
    %c0_i32_0 = arith.constant 0 : i32
    %c0_i32_1 = arith.constant 0 : i32
    %c0_i32_2 = arith.constant 0 : i32
    return %c0_i32, %c0_i32_0, %c0_i32_1 : i32, i32, i32
  }
  func.func @transform_4(%arg0: i32) -> (i32, i32, i32) {
    %c0_i32 = arith.constant 0 : i32
    %c0_i32_0 = arith.constant 0 : i32
    %c0_i32_1 = arith.constant 0 : i32
    %c0_i32_2 = arith.constant 0 : i32
    return %c0_i32, %c0_i32_0, %c0_i32_1 : i32, i32, i32
  }
  func.func @transform_5(%arg0: i32) -> (i32, i32, i32) {
    %c0_i32 = arith.constant 0 : i32
    %c0_i32_0 = arith.constant 0 : i32
    %c0_i32_1 = arith.constant 0 : i32
    %c0_i32_2 = arith.constant 0 : i32
    return %c0_i32, %c0_i32_0, %c0_i32_1 : i32, i32, i32
  }
  func.func @transform_6(%arg0: i32) -> (i32, i32, i32) {
    %c0_i32 = arith.constant 0 : i32
    %c0_i32_0 = arith.constant 0 : i32
    %c0_i32_1 = arith.constant 0 : i32
    %c0_i32_2 = arith.constant 0 : i32
    return %c0_i32, %c0_i32_0, %c0_i32_1 : i32, i32, i32
  }
  func.func @transform_7(%arg0: i32) -> (i32, i32, i32) {
    %c0_i32 = arith.constant 0 : i32
    %c0_i32_0 = arith.constant 0 : i32
    %c0_i32_1 = arith.constant 0 : i32
    %c0_i32_2 = arith.constant 0 : i32
    return %c0_i32, %c0_i32_0, %c0_i32_1 : i32, i32, i32
  }
  func.func @transform_8(%arg0: i32) -> (i32, i32, i32) {
    %c0_i32 = arith.constant 0 : i32
    %c0_i32_0 = arith.constant 0 : i32
    %c0_i32_1 = arith.constant 0 : i32
    %c0_i32_2 = arith.constant 0 : i32
    return %c0_i32, %c0_i32_0, %c0_i32_1 : i32, i32, i32
  }
  func.func @transform_9(%arg0: i32) -> (i32, i32, i32) {
    %c0_i32 = arith.constant 0 : i32
    %c0_i32_0 = arith.constant 0 : i32
    %c0_i32_1 = arith.constant 0 : i32
    %c0_i32_2 = arith.constant 0 : i32
    return %c0_i32, %c0_i32_0, %c0_i32_1 : i32, i32, i32
  }
  func.func @transform_10(%arg0: i32) -> (i32, i32, i32) {
    %c0_i32 = arith.constant 0 : i32
    %c0_i32_0 = arith.constant 0 : i32
    %c0_i32_1 = arith.constant 0 : i32
    %c0_i32_2 = arith.constant 0 : i32
    return %c0_i32, %c0_i32_0, %c0_i32_1 : i32, i32, i32
  }
  func.func @transform_11(%arg0: i32) -> (i32, i32, i32) {
    %c0_i32 = arith.constant 0 : i32
    %c0_i32_0 = arith.constant 0 : i32
    %c0_i32_1 = arith.constant 0 : i32
    %c0_i32_2 = arith.constant 0 : i32
    return %c0_i32, %c0_i32_0, %c0_i32_1 : i32, i32, i32
  }
  func.func @transform_12(%arg0: i32) -> (i32, i32, i32) {
    %c0_i32 = arith.constant 0 : i32
    %c0_i32_0 = arith.constant 0 : i32
    %c0_i32_1 = arith.constant 0 : i32
    %c0_i32_2 = arith.constant 0 : i32
    return %c0_i32, %c0_i32_0, %c0_i32_1 : i32, i32, i32
  }
  func.func @transform_13(%arg0: i32) -> (i32, i32) {
    %c0_i32 = arith.constant 0 : i32
    %c0_i32_0 = arith.constant 0 : i32
    %c0_i32_1 = arith.constant 0 : i32
    return %c0_i32, %c0_i32_0 : i32, i32
  }
  func.func @transform_14(%arg0: i32) -> (i32, i32) {
    %c0_i32 = arith.constant 0 : i32
    %c0_i32_0 = arith.constant 0 : i32
    %c0_i32_1 = arith.constant 0 : i32
    return %c0_i32, %c0_i32_0 : i32, i32
  }
  func.func @transform_15(%arg0: i32) -> (i32, i32) {
    %c0_i32 = arith.constant 0 : i32
    %c0_i32_0 = arith.constant 0 : i32
    %c0_i32_1 = arith.constant 0 : i32
    return %c0_i32, %c0_i32_0 : i32, i32
  }
  func.func @transform_16(%arg0: i32) -> (i32, i32) {
    %c0_i32 = arith.constant 0 : i32
    %c0_i32_0 = arith.constant 0 : i32
    %c0_i32_1 = arith.constant 0 : i32
    return %c0_i32, %c0_i32_0 : i32, i32
  }
  func.func @transform_17(%arg0: i32) -> (i32, i32) {
    %c0_i32 = arith.constant 0 : i32
    %c0_i32_0 = arith.constant 0 : i32
    %c0_i32_1 = arith.constant 0 : i32
    return %c0_i32, %c0_i32_0 : i32, i32
  }
}

</mosaic_0001>

<bundles_post_ra>
// kernel: gpt_forward.1
= control target key start
LH: loop header
LB: loop body
LE: loop exit
PB: predicated region body
PF: predicated region fallthrough
CT: control target
= control target key end

     0   :  { %vm65_vm0 = vcmask 261120   ;;  %v2443_v4 = vmov 32.0   ;;  %s2444_s29 = smov 88   ;;  %s2446_s30 = smov 120   ;;  %vm173_vm8 = vcmask 64512   ;;  %s3175_s0 = inlined_call_operand.vmem [shape: f32[16,32], index: 0, kind: input, shape index: {}]   ;;  %s3176_s1 = inlined_call_operand.vmem [shape: f32[2,1,32], index: 1, kind: input, shape index: {}]   ;;  %s3177_s2 = inlined_call_operand.vmem [shape: f32[2,1,32], index: 2, kind: input, shape index: {}]   ;;  %s3178_s4 = inlined_call_operand.vmem [shape: f32[2,1,96], index: 4, kind: input, shape index: {}]   ;;  %s3179_s3 = inlined_call_operand.vmem [shape: f32[2,32,96], index: 3, kind: input, shape index: {}]   ;;  %s3180_s5 = inlined_call_operand.vmem [shape: f32[2,32,32], index: 5, kind: input, shape index: {}]   ;;  %s3181_s6 = inlined_call_operand.vmem [shape: f32[2,1,32], index: 6, kind: input, shape index: {}]   ;;  %s3182_s7 = inlined_call_operand.vmem [shape: f32[2,1,32], index: 7, kind: input, shape index: {}]   ;;  %s3183_s8 = inlined_call_operand.vmem [shape: f32[2,1,32], index: 8, kind: input, shape index: {}]   ;;  %s3184_s10 = inlined_call_operand.vmem [shape: f32[2,1,64], index: 10, kind: input, shape index: {}]   ;;  %s3185_s9 = inlined_call_operand.vmem [shape: f32[2,32,64], index: 9, kind: input, shape index: {}]   ;;  %s3186_s11 = inlined_call_operand.vmem [shape: f32[2,64,32], index: 11, kind: input, shape index: {}]   ;;  %s3187_s12 = inlined_call_operand.vmem [shape: f32[2,1,32], index: 12, kind: input, shape index: {}]   ;;  %s3188_s15 = inlined_call_operand.vmem [shape: f32[128,32], index: 15, kind: input, shape index: {}]   ;;  %s3189_s13 = inlined_call_operand.vmem [shape: f32[1,32], index: 13, kind: input, shape index: {}]   ;;  %s3190_s14 = inlined_call_operand.vmem [shape: f32[1,32], index: 14, kind: input, shape index: {}]   ;;  %s3191_s16 = inlined_call_operand.vmem [shape: f32[1,128], index: 16, kind: input, shape index: {}]   ;;  %s3192_s17 = inlined_call_operand.vmem [shape: f32[16,128], index: 17, kind: output, shape index: {}]  }
   0x1   :  { %3205 = sst [smem:[#allocation2_spill]] %s3175_s0  ;;  %2341 = vrcp.f32 %v2443_v4  ;;  %v130_v21 = vld [vmem:[%s3179_s3 + $0x18] sm:$0xff]  ;;  %v129_v22 = vld [vmem:[%s3179_s3 + $0x10] sm:$0xff]  ;;  %v128_v23 = vld [vmem:[%s3179_s3 + $0x8] sm:$0xff]  ;;  %s2445_s0 = smov 96   ;;  %v58_v4 = vlaneseq }
   0x2   :  { %3206 = sst [smem:[#allocation3_spill]] %s3176_s1  ;;  %153 = vmatpush.msra.mxu0 %v130_v21  ;;  %v127_v24 = vld [vmem:[%s3179_s3] sm:$0xff]  ;;  %s2447_s18 = smov 64  }
   0x3   :  { %s3207_s26 = sld [smem:[#allocation2_spill]]  ;;  %v2323_v43 = vld [vmem:[%s3177_s2] ss:$0 sm:$0xff]  ;;  %s2448_s19 = smov 80  }
   0x4   :  { %154 = vmatpush.msra.mxu0 %v129_v22  ;;  %s3208_s24 = sld [smem:[#allocation3_spill]]  ;;  %v2326_v53 = vld [vmem:[%s3178_s4] ss:$0 sm:$0xff]  ;;  %s3203_s1 = smov 112  }
   0x5   :  { %s2450_s20 = smov 56   ;;  %s3201_s21 = smov 72  }
   0x6   :  { %155 = vmatpush.msra.mxu0 %v128_v23  ;;  %s3199_s22 = smov 104   ;;  %s3197_s23 = smov 48  }
   0x7   :  { %v2342_v5 = vpop.eup %2341  ;;  %s3195_s25 = smov 40  }
   0x8   :  { %v73_v6 = vmul.f32 32.0, %v2342_v5  ;;  %vm77_vm1 = vweird.f32 %v2342_v5  ;;  %156 = vmatpush.msra.mxu0 %v127_v24 }
   0x9   :  { %v2548_v0 = vld [vmem:[%s3207_s26] sm:$0xff]  ;;  %v2555_v2 = vld [vmem:[%s3207_s26 + $0x8] sm:$0xff] }
   0xa   :  { %v66_v1 = vsel %vm65_vm0, %v2548_v0, 0.0  ;;  %v69_v3 = vsel %vm65_vm0, %v2555_v2, 0.0  ;;  %v74_v7 = vsub.f32 1.0, %v73_v6  ;;  %v2322_v39 = vld [vmem:[%s3208_s24] ss:$0 sm:$0xff]  ;;  %v61_v6 = vand.u32 127, %v58_v4 }
   0xb   :  { %67 = vadd.xlane.f32.xlu0 %v66_v1 }
   0xc   :  { %v75_v8 = vmul.f32 %v2342_v5, %v74_v7 }
   0xe   :  { %v76_v9 = vadd.f32 %v2342_v5, %v75_v8 }
  0x10   :  { %v2559_v10 = vsel %vm77_vm1, %v2342_v5, %v76_v9  ;;  %v59_v5 = vshrl.u32 %v58_v4, 7  ;;  %v167_v4 = vld [vmem:[%s3180_s5 + $0x8] sm:$0xff] }
  0x12   :  { %vm2624_vm9 = vcmp.gt.s32.totalorder %v61_v6, %v59_v5 }
  0x13   :  { %70 = vadd.xlane.f32.xlu0 %v69_v3 }
  0x7e   :  { %v68_v11 = vpop.xlane.xlu0 %67 }
  0x7f   :  { %v79_v12 = vmul.f32 %v2559_v10, %v68_v11 }
  0x81   :  { %v81_v13 = vsub.f32 %v2548_v0, %v79_v12 }
  0x83   :  { %v83_v14 = vmul.f32 %v81_v13, %v81_v13 }
  0x85   :  { %v85_v15 = vsel %vm65_vm0, %v83_v14, 0.0 }
  0x86   :  { %86 = vadd.xlane.f32.xlu1 %v85_v15  ;;  %v71_v16 = vpop.xlane.xlu0 %70 }
  0x87   :  { %v80_v17 = vmul.f32 %v2559_v10, %v71_v16 }
  0x89   :  { %v82_v18 = vsub.f32 %v2555_v2, %v80_v17 }
  0x8b   :  { %v84_v19 = vmul.f32 %v82_v18, %v82_v18 }
  0x8d   :  { %v88_v20 = vsel %vm65_vm0, %v84_v19, 0.0 }
  0x8e   :  { %89 = vadd.xlane.f32.xlu1 %v88_v20 }
  0xf9   :  { %v87_v25 = vpop.xlane.xlu1 %86 }
  0xfa   :  { %v91_v26 = vmul.f32 %v87_v25, %v2559_v10 }
  0xfc   :  { %v93_v27 = vadd.f32 1e-05, %v91_v26 }
  0xfe   :  { %2343 = vrsqrt.f32 %v93_v27  ;;  %vm101_vm3 = vweird.f32 %v93_v27 }
 0x101   :  { %v90_v28 = vpop.xlane.xlu1 %89 }
 0x102   :  { %v92_v29 = vmul.f32 %v90_v28, %v2559_v10 }
 0x104   :  { %v2344_v30 = vpop.eup %2343  ;;  %v94_v31 = vadd.f32 1e-05, %v92_v29 }
 0x105   :  { %v96_v32 = vmul.f32 %v2344_v30, %v93_v27  ;;  %vm102_vm2 = vweird.f32 %v2344_v30 }
 0x106   :  { %2345 = vrsqrt.f32 %v94_v31  ;;  %vm103_vm4 = vmor %vm101_vm3, %vm102_vm2  ;;  %vm111_vm5 = vweird.f32 %v94_v31 }
 0x107   :  { %v97_v33 = vmul.f32 %v2344_v30, %v96_v32 }
 0x109   :  { %v98_v34 = vmul.f32 0.5, %v97_v33 }
 0x10b   :  { %v99_v35 = vsub.f32 1.5, %v98_v34 }
 0x10c   :  { %v2346_v36 = vpop.eup %2345 }
 0x10d   :  { %v100_v37 = vmul.f32 %v2344_v30, %v99_v35  ;;  %v106_v38 = vmul.f32 %v2346_v36, %v94_v31  ;;  %vm112_vm6 = vweird.f32 %v2346_v36 }
 0x10e   :  { %vm113_vm7 = vmor %vm111_vm5, %vm112_vm6  ;;  %vm1014_vm6 = vcmask 523264  }
 0x10f   :  { %v104_v40 = vsel %vm103_vm4, %v2344_v30, %v100_v37  ;;  %v107_v41 = vmul.f32 %v2346_v36, %v106_v38 }
 0x110   :  { %v115_v42 = vmul.f32 %v104_v40, %v81_v13 }
 0x111   :  { %v108_v44 = vmul.f32 0.5, %v107_v41 }
 0x112   :  { %v120_v45 = vmul.f32 %v2322_v39, %v115_v42 }
 0x113   :  { %v109_v46 = vsub.f32 1.5, %v108_v44 }
 0x114   :  { %v125_v47 = vadd.f32 %v2323_v43, %v120_v45  ;;  %v166_v45 = vld [vmem:[%s3180_s5] sm:$0xff] }
 0x115   :  { %v110_v48 = vmul.f32 %v2346_v36, %v109_v46  ;;  %487 = vmatpush.msrb.mxu0 %v166_v45 }
 0x116   :  { %2188 = vmatmul.msk.f32.vlgmr.msra.gmra.mxu0 %vm65_vm0, %v125_v47 }
 0x117   :  { %v114_v49 = vsel %vm113_vm7, %v2346_v36, %v110_v48 }
 0x118   :  { %v116_v50 = vmul.f32 %v114_v49, %v82_v18 }
 0x11a   :  { %v121_v51 = vmul.f32 %v2322_v39, %v116_v50 }
 0x11c   :  { %v126_v52 = vadd.f32 %v2323_v43, %v121_v51 }
 0x11e   :  { %2189 = vmatmul.msk.f32.gmra.mxu0 %vm65_vm0, %v126_v52 }
 0x193   :  { %v158_v54 = vpop.f32.mrf.mxu0 }
 0x194   :  { %v2592_v55 = vadd.f32 %v2326_v53, %v158_v54 }
 0x196   :  { %307 = vrot.lane.b32.xlu0 %v2592_v55, %s2444_s29  ;;  %171 = vrot.lane.b32.xlu2 %v2592_v55, %s2445_s0  ;;  %v2599_v56 = vmul.f32 0.35355338, %v2592_v55 }
 0x198   :  { %305 = vrot.lane.b32.xlu1 %v2599_v56, %s2446_s30 }
 0x19b   :  { %v161_v57 = vpop.f32.mrf.mxu0 }
 0x19c   :  { %v2603_v58 = vadd.f32 %v2326_v53, %v161_v57 }
 0x19e   :  { %200 = vrot.lane.b32.xlu2 %v2603_v58, %s2445_s0  ;;  %v2610_v59 = vmul.f32 0.35355338, %v2603_v58 }
 0x1a6   :  { %335 = vrot.lane.b32.xlu2 %v2603_v58, %s2444_s29 }
 0x1ae   :  { %333 = vrot.lane.b32.xlu2 %v2610_v59, %s2446_s30 }
 0x1f0   :  { %v172_v60 = vpop.permute.xlu2 %171 }
 0x1f1   :  { %2190 = vmatpush.xpose.msk.msra.mxu3 %vm173_vm8, %v172_v60 }
 0x1f4   :  { %2191 = vmatmul.msk.f32.vlgmr.msra.gmra.mxu3 %vm173_vm8, %v2599_v56 }
 0x1f8   :  { %v201_v61 = vpop.permute.xlu2 %200 }
 0x1f9   :  { %2192 = vmatpush.xpose.msk.msra.mxu2 %vm173_vm8, %v201_v61 }
 0x1fc   :  { %2193 = vmatmul.msk.f32.vlgmr.msra.gmra.mxu2 %vm173_vm8, %v2610_v59 }
 0x200   :  { %v336_v62 = vpop.permute.xlu2 %335 }
 0x201   :  { %2198 = vmatpush.xpose.msk.msrb.mxu2 %vm173_vm8, %v336_v62 }
 0x205   :  { %458 = vmatpush.msra.mxu2 %v167_v4 }
 0x208   :  { %v334_v63 = vpop.permute.xlu2 %333  ;;  %v308_v1 = vpop.permute.xlu0 %307 }
 0x209   :  { %2196 = vmatpush.xpose.msk.msra.mxu1 %vm173_vm8, %v308_v1  ;;  %2199 = vmatmul.msk.f32.vlgmr.msrb.gmra.mxu2 %vm173_vm8, %v334_v63 }
 0x20a   :  { %v306_v3 = vpop.permute.xlu1 %305 }
 0x20c   :  { %2197 = vmatmul.msk.f32.vlgmr.msra.gmra.mxu1 %vm173_vm8, %v306_v3 }
 0x277   :  { %v196_v8 = vpop.f32.mrf.mxu3 }
 0x278   :  { %v229_v9 = vsel %vm2624_vm9, -inf, %v196_v8 }
 0x279   :  { %v231_v11 = vsel %vm173_vm8, %v229_v9, -inf }
 0x27a   :  { %232 = vmax.xlane.f32.xlu2 %v231_v11 }
 0x27f   :  { %v224_v12 = vpop.f32.mrf.mxu2 }
 0x280   :  { %v230_v13 = vsel %vm2624_vm9, -inf, %v224_v12 }
 0x281   :  { %v234_v14 = vsel %vm173_vm8, %v230_v13, -inf }
 0x282   :  { %235 = vmax.xlane.f32.xlu0 %v234_v14 }
 0x289   :  { %v330_v15 = vpop.f32.mrf.mxu1 }
 0x28a   :  { %v361_v16 = vsel %vm2624_vm9, -inf, %v330_v15 }
 0x28b   :  { %v363_v17 = vsel %vm173_vm8, %v361_v16, -inf }
 0x28c   :  { %364 = vmax.xlane.f32.xlu1 %v363_v17  ;;  %v358_v35 = vpop.f32.mrf.mxu2 }
 0x28d   :  { %v362_v36 = vsel %vm2624_vm9, -inf, %v358_v35 }
 0x28e   :  { %v366_v37 = vsel %vm173_vm8, %v362_v36, -inf }
 0x292   :  { %253 = vrot.lane.b32.xlu2 %v2592_v55, %s2447_s18 }
 0x296   :  { %279 = vrot.lane.b32.xlu0 %v2603_v58, %s2447_s18 }
 0x2ed   :  { %v233_v18 = vpop.xlane.xlu2 %232 }
 0x2ee   :  { %v237_v19 = vsub.f32 %v229_v9, %v233_v18 }
 0x2f0   :  { %v239_v20 = vmul.f32 1.442695, %v237_v19 }
 0x2f2   :  { %2347 = vpow2.f32 %v239_v20 }
 0x2f5   :  { %v254_v21 = vpop.permute.xlu2 %253  ;;  %v236_v22 = vpop.xlane.xlu0 %235 }
 0x2f6   :  { %v238_v23 = vsub.f32 %v230_v13, %v236_v22  ;;  %274 = vmatpush.msrb.mxu3 %v254_v21 }
 0x2f8   :  { %v2348_v24 = vpop.eup %2347  ;;  %v241_v25 = vmul.f32 1.442695, %v238_v23 }
 0x2f9   :  { %v243_v26 = vsel %vm173_vm8, %v2348_v24, 0.0 }
 0x2fa   :  { %2349 = vpow2.f32 %v241_v25  ;;  %244 = vadd.xlane.f32.xlu2 %v243_v26 }
 0x2ff   :  { %v365_v27 = vpop.xlane.xlu1 %364 }
 0x300   :  { %v2350_v28 = vpop.eup %2349  ;;  %v369_v29 = vsub.f32 %v361_v16, %v365_v27 }
 0x301   :  { %v246_v30 = vsel %vm173_vm8, %v2350_v28, 0.0 }
 0x302   :  { %v371_v31 = vmul.f32 1.442695, %v369_v29  ;;  %247 = vadd.xlane.f32.xlu0 %v246_v30 }
 0x304   :  { %2351 = vpow2.f32 %v371_v31 }
 0x308   :  { %v280_v32 = vpop.permute.xlu0 %279 }
 0x309   :  { %300 = vmatpush.msra.mxu3 %v280_v32 }
 0x30a   :  { %v2352_v33 = vpop.eup %2351 }
 0x30b   :  { %v375_v34 = vsel %vm173_vm8, %v2352_v33, 0.0 }
 0x30c   :  { %376 = vadd.xlane.f32.xlu1 %v375_v34 }
 0x312   :  { %497 = vrot.lane.b32.xlu2 %v2592_v55, %s2448_s19 }
 0x316   :  { %495 = vrot.lane.b32.xlu0 %v2599_v56, %s3203_s1 }
 0x325   :  { %385 = vrot.lane.b32.xlu1 %v2592_v55, %s2450_s20 }
 0x32d   :  { %411 = vrot.lane.b32.xlu1 %v2603_v58, %s2450_s20 }
 0x335   :  { %525 = vrot.lane.b32.xlu1 %v2603_v58, %s2448_s19 }
 0x33b   :  { %367 = vmax.xlane.f32.xlu2 %v366_v37 }
 0x33d   :  { %523 = vrot.lane.b32.xlu1 %v2610_v59, %s3203_s1 }
 0x345   :  { %660 = vrot.lane.b32.xlu1 %v2592_v55, %s3201_s21 }
 0x34d   :  { %658 = vrot.lane.b32.xlu1 %v2599_v56, %s3199_s22 }
 0x355   :  { %575 = vrot.lane.b32.xlu1 %v2592_v55, %s3197_s23 }
 0x36d   :  { %v245_v38 = vpop.xlane.xlu2 %244 }
 0x36e   :  { %2353 = vrcp.f32 %v245_v38 }
 0x374   :  { %v2354_v39 = vpop.eup %2353 }
 0x375   :  { %v248_v40 = vpop.xlane.xlu0 %247  ;;  %v251_v41 = vmul.f32 %v2354_v39, %v2348_v24  ;;  %v498_v49 = vpop.permute.xlu2 %497 }
 0x376   :  { %2355 = vrcp.f32 %v248_v40 }
 0x377   :  { %2194 = vmatmul.msk.f32.vlgmr.msrb.gmra.mxu3 %vm173_vm8, %v251_v41 }
 0x37c   :  { %v2356_v42 = vpop.eup %2355 }
 0x37d   :  { %v252_v43 = vmul.f32 %v2356_v42, %v2350_v28  ;;  %v168_v42 = vld [vmem:[%s3180_s5 + $0x10] sm:$0xff] }
 0x37e   :  { %648 = vmatpush.msrb.mxu2 %v168_v42 }
 0x37f   :  { %2195 = vmatmul.msk.f32.vlgmr.msra.gmra.mxu3 %vm173_vm8, %v252_v43  ;;  %v377_v44 = vpop.xlane.xlu1 %376 }
 0x380   :  { %2357 = vrcp.f32 %v377_v44 }
 0x386   :  { %v2358_v46 = vpop.eup %2357 }
 0x387   :  { %v383_v47 = vmul.f32 %v2358_v46, %v2352_v33 }
 0x388   :  { %v496_v51 = vpop.permute.xlu0 %495 }
 0x397   :  { %v386_v48 = vpop.permute.xlu1 %385 }
 0x398   :  { %406 = vmatpush.msrb.mxu3 %v386_v48 }
 0x399   :  { %2200 = vmatmul.msk.f32.vlgmr.msrb.gmra.mxu3 %vm173_vm8, %v383_v47 }
 0x39a   :  { %2206 = vmatpush.xpose.msk.msra.mxu3 %vm173_vm8, %v498_v49 }
 0x39f   :  { %v412_v50 = vpop.permute.xlu1 %411 }
 0x3a0   :  { %432 = vmatpush.msrb.mxu1 %v412_v50 }
 0x3a1   :  { %2207 = vmatmul.msk.f32.vlgmr.msra.gmra.mxu3 %vm173_vm8, %v496_v51 }
 0x3a7   :  { %v526_v52 = vpop.permute.xlu1 %525 }
 0x3a8   :  { %2208 = vmatpush.xpose.msk.msra.mxu1 %vm173_vm8, %v526_v52 }
 0x3ae   :  { %v368_v53 = vpop.xlane.xlu2 %367 }
 0x3af   :  { %v370_v54 = vsub.f32 %v362_v36, %v368_v53  ;;  %v524_v56 = vpop.permute.xlu1 %523 }
 0x3b1   :  { %v373_v57 = vmul.f32 1.442695, %v370_v54 }
 0x3b3   :  { %2359 = vpow2.f32 %v373_v57 }
 0x3b7   :  { %v661_v60 = vpop.permute.xlu1 %660 }
 0x3b8   :  { %2214 = vmatpush.xpose.msk.msra.mxu0 %vm173_vm8, %v661_v60 }
 0x3b9   :  { %v2360_v61 = vpop.eup %2359 }
 0x3ba   :  { %v378_v62 = vsel %vm173_vm8, %v2360_v61, 0.0 }
 0x3bb   :  { %379 = vadd.xlane.f32.xlu0 %v378_v62 }
 0x3bf   :  { %v659_v63 = vpop.permute.xlu1 %658 }
 0x3c7   :  { %v576_v1 = vpop.permute.xlu1 %575 }
 0x3c8   :  { %596 = vmatpush.msrb.mxu3 %v576_v1 }
 0x3fa   :  { %v276_v3 = vpop.f32.mrf.mxu3 }
 0x3fb   :  { %2204 = vmatmul.msk.f32.vlgmr.msrb.gmra.mxu0 %vm173_vm8, %v276_v3 }
 0x402   :  { %v302_v5 = vpop.f32.mrf.mxu3 }
 0x403   :  { %2205 = vmatmul.msk.f32.gmra.mxu0 %vm173_vm8, %v302_v5 }
 0x40b   :  { %2215 = vmatmul.msk.f32.vlgmr.msra.gmra.mxu0 %vm173_vm8, %v659_v63  ;;  %v169_v63 = vld [vmem:[%s3180_s5 + $0x18] sm:$0xff] }
 0x41c   :  { %v408_v6 = vpop.f32.mrf.mxu3 }
 0x41d   :  { %2202 = vmatmul.msk.f32.vlgmr.msra.gmra.mxu2 %vm173_vm8, %v408_v6 }
 0x424   :  { %v520_v8 = vpop.f32.mrf.mxu3 }
 0x425   :  { %v551_v9 = vsel %vm2624_vm9, -inf, %v520_v8 }
 0x426   :  { %v553_v11 = vsel %vm173_vm8, %v551_v9, -inf }
 0x427   :  { %554 = vmax.xlane.f32.xlu2 %v553_v11 }
 0x42e   :  { %v380_v12 = vpop.xlane.xlu0 %379 }
 0x42f   :  { %2361 = vrcp.f32 %v380_v12 }
 0x435   :  { %v2362_v13 = vpop.eup %2361 }
 0x436   :  { %v384_v14 = vmul.f32 %v2362_v13, %v2360_v61 }
 0x438   :  { %2201 = vmatmul.msk.f32.vlgmr.msrb.gmra.mxu1 %vm173_vm8, %v384_v14 }
 0x43f   :  { %688 = vrot.lane.b32.xlu2 %v2603_v58, %s3201_s21 }
 0x440   :  { %2209 = vmatmul.msk.f32.vlgmr.msra.gmra.mxu1 %vm173_vm8, %v524_v56 }
 0x478   :  { %v2698_v25 = vpop.f32.mrf.mxu0 }
 0x480   :  { %v2700_v26 = vpop.f32.mrf.mxu0 }
 0x488   :  { %v683_v27 = vpop.f32.mrf.mxu0 }
 0x489   :  { %v714_v28 = vsel %vm2624_vm9, -inf, %v683_v27 }
 0x48a   :  { %v716_v29 = vsel %vm173_vm8, %v714_v28, -inf }
 0x49a   :  { %v555_v15 = vpop.xlane.xlu2 %554 }
 0x49b   :  { %v559_v16 = vsub.f32 %v551_v9, %v555_v15 }
 0x49d   :  { %v561_v17 = vmul.f32 1.442695, %v559_v16  ;;  %v2327_v16 = vld [vmem:[%s3181_s6] ss:$0 sm:$0xff] }
 0x49f   :  { %2363 = vpow2.f32 %v561_v17 }
 0x4a0   :  { %v460_v8 = vpop.f32.mrf.mxu2 }
 0x4a1   :  { %v490_v12 = vadd.f32 %v2698_v25, %v460_v8 }
 0x4a2   :  { %v689_v18 = vpop.permute.xlu2 %688 }
 0x4a3   :  { %2216 = vmatpush.xpose.msk.msra.mxu3 %vm173_vm8, %v689_v18 }
 0x4a5   :  { %v2364_v19 = vpop.eup %2363 }
 0x4a6   :  { %v565_v20 = vsel %vm173_vm8, %v2364_v19, 0.0 }
 0x4a7   :  { %566 = vadd.xlane.f32.xlu0 %v565_v20 }
 0x4b5   :  { %v434_v21 = vpop.f32.mrf.mxu1 }
 0x4b6   :  { %2203 = vmatmul.msk.f32.gmra.mxu2 %vm173_vm8, %v434_v21 }
 0x4bb   :  { %686 = vrot.lane.b32.xlu0 %v2610_v59, %s3199_s22 }
 0x4bd   :  { %v548_v22 = vpop.f32.mrf.mxu1 }
 0x4be   :  { %v552_v23 = vsel %vm2624_vm9, -inf, %v548_v22 }
 0x4bf   :  { %v556_v24 = vsel %vm173_vm8, %v552_v23, -inf }
 0x4c0   :  { %557 = vmax.xlane.f32.xlu1 %v556_v24 }
 0x4e5   :  { %717 = vmax.xlane.f32.xlu0 %v716_v29 }
 0x4f9   :  { %738 = vrot.lane.b32.xlu0 %v2592_v55, %s3195_s25 }
 0x51a   :  { %v567_v59 = vpop.xlane.xlu0 %566 }
 0x51b   :  { %2365 = vrcp.f32 %v567_v59 }
 0x521   :  { %v2366_v30 = vpop.eup %2365 }
 0x522   :  { %v573_v31 = vmul.f32 %v2366_v30, %v2364_v19 }
 0x524   :  { %2210 = vmatmul.msk.f32.vlgmr.msrb.gmra.mxu3 %vm173_vm8, %v573_v31 }
 0x525   :  { %811 = vmatpush.msrb.mxu3 %v169_v63  ;;  %v1009_v63 = vld [vmem:[%s3186_s11 + $0x38] sm:$0xff] }
 0x52d   :  { %v687_v32 = vpop.permute.xlu0 %686 }
 0x52e   :  { %2217 = vmatmul.msk.f32.vlgmr.msra.gmra.mxu3 %vm173_vm8, %v687_v32 }
 0x533   :  { %v558_v33 = vpop.xlane.xlu1 %557 }
 0x534   :  { %v560_v34 = vsub.f32 %v552_v23, %v558_v33  ;;  %v888_v33 = vld [vmem:[%s3185_s9 + $0x18] sm:$0xff] }
 0x535   :  { %911 = vmatpush.msra.mxu2 %v888_v33 }
 0x536   :  { %v563_v35 = vmul.f32 1.442695, %v560_v34  ;;  %v885_v34 = vld [vmem:[%s3185_s9] sm:$0xff] }
 0x538   :  { %2367 = vpow2.f32 %v563_v35 }
 0x539   :  { %v463_v9 = vpop.f32.mrf.mxu2 }
 0x53e   :  { %v2368_v36 = vpop.eup %2367 }
 0x53f   :  { %v568_v37 = vsel %vm173_vm8, %v2368_v36, 0.0 }
 0x540   :  { %569 = vadd.xlane.f32.xlu2 %v568_v37 }
 0x558   :  { %v718_v38 = vpop.xlane.xlu0 %717 }
 0x559   :  { %v722_v39 = vsub.f32 %v714_v28, %v718_v38 }
 0x55b   :  { %v724_v55 = vmul.f32 1.442695, %v722_v39 }
 0x55d   :  { %2369 = vpow2.f32 %v724_v55 }
 0x563   :  { %v2370_v40 = vpop.eup %2369 }
 0x564   :  { %v728_v41 = vsel %vm173_vm8, %v2370_v40, 0.0 }
 0x565   :  { %729 = vadd.xlane.f32.xlu1 %v728_v41 }
 0x56b   :  { %v739_v51 = vpop.permute.xlu0 %738 }
 0x57e   :  { %601 = vrot.lane.b32.xlu1 %v2603_v58, %s3197_s23 }
 0x586   :  { %764 = vrot.lane.b32.xlu1 %v2603_v58, %s3195_s25 }
 0x5a7   :  { %v598_v43 = vpop.f32.mrf.mxu3 }
 0x5a8   :  { %2212 = vmatmul.msk.f32.vlgmr.msrb.gmra.mxu2 %vm173_vm8, %v598_v43  ;;  %v2766_v43 = vld [vmem:[%s3182_s7] ss:$0 sm:$0xff] }
 0x5b1   :  { %v711_v44 = vpop.f32.mrf.mxu3 }
 0x5b2   :  { %v715_v45 = vsel %vm2624_vm9, -inf, %v711_v44 }
 0x5b3   :  { %v719_v46 = vsel %vm173_vm8, %v715_v45, -inf  ;;  %v570_v47 = vpop.xlane.xlu2 %569 }
 0x5b4   :  { %720 = vmax.xlane.f32.xlu2 %v719_v46  ;;  %2371 = vrcp.f32 %v570_v47  ;;  %v2771_v46 = vld [vmem:[%s3183_s8] ss:$0 sm:$0xff] }
 0x5ba   :  { %v2372_v49 = vpop.eup %2371 }
 0x5bb   :  { %v574_v58 = vmul.f32 %v2372_v49, %v2368_v36 }
 0x5d8   :  { %v730_v48 = vpop.xlane.xlu1 %729 }
 0x5d9   :  { %2373 = vrcp.f32 %v730_v48 }
 0x5df   :  { %v2374_v52 = vpop.eup %2373 }
 0x5e0   :  { %v736_v53 = vmul.f32 %v2374_v52, %v2370_v40 }
 0x5f0   :  { %v602_v50 = vpop.permute.xlu1 %601 }
 0x5f1   :  { %622 = vmatpush.msrb.mxu1 %v602_v50 }
 0x5f2   :  { %2211 = vmatmul.msk.f32.vlgmr.msrb.gmra.mxu1 %vm173_vm8, %v574_v58 }
 0x5f3   :  { %759 = vmatpush.msra.mxu1 %v739_v51 }
 0x5f8   :  { %v765_v54 = vpop.permute.xlu1 %764 }
 0x5f9   :  { %785 = vmatpush.msrb.mxu0 %v765_v54 }
 0x5fa   :  { %2218 = vmatmul.msk.f32.vlgmr.msra.gmra.mxu1 %vm173_vm8, %v736_v53  ;;  %v2786_v53 = vld [vmem:[%s3184_s10] ss:$0 sm:$0xff] }
 0x627   :  { %v721_v56 = vpop.xlane.xlu2 %720 }
 0x628   :  { %v723_v57 = vsub.f32 %v715_v45, %v721_v56 }
 0x62a   :  { %v726_v60 = vmul.f32 1.442695, %v723_v57 }
 0x62b   :  { %v650_v11 = vpop.f32.mrf.mxu2 }
 0x62c   :  { %2375 = vpow2.f32 %v726_v60  ;;  %v656_v13 = vadd.f32 %v650_v11, %v490_v12  ;;  %v1005_v11 = vld [vmem:[%s3186_s11 + $0x18] sm:$0xff] }
 0x632   :  { %v2376_v61 = vpop.eup %2375 }
 0x633   :  { %v731_v62 = vsel %vm173_vm8, %v2376_v61, 0.0 }
 0x634   :  { %732 = vadd.xlane.f32.xlu2 %v731_v62 }
 0x66f   :  { %v624_v1 = vpop.f32.mrf.mxu1 }
 0x670   :  { %2213 = vmatmul.msk.f32.gmra.mxu2 %vm173_vm8, %v624_v1  ;;  %v1008_v1 = vld [vmem:[%s3186_s11 + $0x30] sm:$0xff] }
 0x677   :  { %v761_v3 = vpop.f32.mrf.mxu1 }
 0x678   :  { %2220 = vmatmul.msk.f32.vlgmr.msrb.gmra.mxu3 %vm173_vm8, %v761_v3 }
 0x6a7   :  { %v733_v4 = vpop.xlane.xlu2 %732 }
 0x6a8   :  { %2377 = vrcp.f32 %v733_v4  ;;  %v1007_v4 = vld [vmem:[%s3186_s11 + $0x28] sm:$0xff] }
 0x6ae   :  { %v2378_v5 = vpop.eup %2377 }
 0x6af   :  { %v737_v6 = vmul.f32 %v2378_v5, %v2376_v61 }
 0x6b1   :  { %2219 = vmatmul.msk.f32.vlgmr.msrb.gmra.mxu0 %vm173_vm8, %v737_v6  ;;  %v1006_v6 = vld [vmem:[%s3186_s11 + $0x20] sm:$0xff] }
 0x6f3   :  { %v653_v27 = vpop.f32.mrf.mxu2 }
 0x6fb   :  { %v813_v14 = vpop.f32.mrf.mxu3 }
 0x6fc   :  { %v819_v15 = vadd.f32 %v813_v14, %v656_v13 }
 0x6fe   :  { %v821_v17 = vadd.f32 %v819_v15, %v2548_v0  ;;  %v493_v0 = vadd.f32 %v2700_v26, %v463_v9  ;;  %v887_v26 = vld [vmem:[%s3185_s9 + $0x10] sm:$0xff] }
 0x6ff   :  { %912 = vmatpush.msra.mxu2 %v887_v26  ;;  %v1004_v15 = vld [vmem:[%s3186_s11 + $0x10] sm:$0xff] }
 0x700   :  { %v2736_v18 = vadd.f32 %v2327_v16, %v821_v17  ;;  %v657_v28 = vadd.f32 %v653_v27, %v493_v0 }
 0x702   :  { %v831_v19 = vsel %vm65_vm0, %v2736_v18, 0.0 }
 0x703   :  { %832 = vadd.xlane.f32.xlu2 %v831_v19 }
 0x72e   :  { %v787_v20 = vpop.f32.mrf.mxu0 }
 0x72f   :  { %2221 = vmatmul.msk.f32.gmra.mxu3 %vm173_vm8, %v787_v20 }
 0x776   :  { %v833_v21 = vpop.xlane.xlu2 %832 }
 0x777   :  { %v837_v22 = vmul.f32 %v833_v21, %v2559_v10  ;;  %v1002_v21 = vld [vmem:[%s3186_s11] sm:$0xff] }
 0x779   :  { %v839_v23 = vsub.f32 %v2736_v18, %v837_v22 }
 0x77b   :  { %v841_v24 = vmul.f32 %v839_v23, %v839_v23 }
 0x77d   :  { %v843_v25 = vsel %vm65_vm0, %v841_v24, 0.0 }
 0x77e   :  { %844 = vadd.xlane.f32.xlu0 %v843_v25 }
 0x7b2   :  { %v816_v29 = vpop.f32.mrf.mxu3 }
 0x7b3   :  { %v820_v59 = vadd.f32 %v816_v29, %v657_v28 }
 0x7b5   :  { %v822_v30 = vadd.f32 %v820_v59, %v2555_v2  ;;  %v886_v2 = vld [vmem:[%s3185_s9 + $0x8] sm:$0xff] }
 0x7b6   :  { %913 = vmatpush.msra.mxu2 %v886_v2 }
 0x7b7   :  { %v2746_v31 = vadd.f32 %v2327_v16, %v822_v30  ;;  %v1003_v16 = vld [vmem:[%s3186_s11 + $0x8] sm:$0xff] }
 0x7b8   :  { %914 = vmatpush.msra.mxu2 %v885_v34 }
 0x7b9   :  { %v834_v32 = vsel %vm65_vm0, %v2746_v31, 0.0 }
 0x7ba   :  { %835 = vadd.xlane.f32.xlu1 %v834_v32  ;;  %1029 = vmatpush.msrb.mxu2 %v1009_v63 }
 0x7bc   :  { %1030 = vmatpush.msrb.mxu2 %v1008_v1 }
 0x7be   :  { %1031 = vmatpush.msrb.mxu2 %v1007_v4 }
 0x7c0   :  { %1032 = vmatpush.msrb.mxu2 %v1006_v6 }
 0x7c2   :  { %1033 = vmatpush.msrb.mxu2 %v1005_v11 }
 0x7c4   :  { %1034 = vmatpush.msrb.mxu2 %v1004_v15 }
 0x7c6   :  { %1035 = vmatpush.msrb.mxu2 %v1003_v16 }
 0x7c8   :  { %1036 = vmatpush.msrb.mxu2 %v1002_v21 }
 0x7f1   :  { %v845_v35 = vpop.xlane.xlu0 %844 }
 0x7f2   :  { %v849_v36 = vmul.f32 %v845_v35, %v2559_v10 }
 0x7f4   :  { %v851_v37 = vadd.f32 1e-05, %v849_v36 }
 0x7f6   :  { %2379 = vrsqrt.f32 %v851_v37  ;;  %vm859_vm11 = vweird.f32 %v851_v37 }
 0x7fc   :  { %v2380_v38 = vpop.eup %2379 }
 0x7fd   :  { %v854_v39 = vmul.f32 %v2380_v38, %v851_v37  ;;  %vm860_vm10 = vweird.f32 %v2380_v38 }
 0x7fe   :  { %vm861_vm12 = vmor %vm859_vm11, %vm860_vm10 }
 0x7ff   :  { %v855_v55 = vmul.f32 %v2380_v38, %v854_v39 }
 0x801   :  { %v856_v40 = vmul.f32 0.5, %v855_v55 }
 0x803   :  { %v857_v41 = vsub.f32 1.5, %v856_v40 }
 0x805   :  { %v858_v42 = vmul.f32 %v2380_v38, %v857_v41 }
 0x807   :  { %v862_v44 = vsel %vm861_vm12, %v2380_v38, %v858_v42 }
 0x808   :  { %v873_v45 = vmul.f32 %v862_v44, %v839_v23 }
 0x80a   :  { %v878_v47 = vmul.f32 %v2766_v43, %v873_v45 }
 0x80c   :  { %v883_v48 = vadd.f32 %v2771_v46, %v878_v47 }
 0x80e   :  { %2222 = vmatmul.msk.f32.vlgmr.msra.gmra.mxu2 %vm65_vm0, %v883_v48 }
 0x82d   :  { %v836_v49 = vpop.xlane.xlu1 %835 }
 0x82e   :  { %v838_v58 = vmul.f32 %v836_v49, %v2559_v10 }
 0x830   :  { %v2778_v50 = vsub.f32 %v2746_v31, %v838_v58 }
 0x832   :  { %v842_v51 = vmul.f32 %v2778_v50, %v2778_v50 }
 0x834   :  { %v846_v52 = vsel %vm65_vm0, %v842_v51, 0.0 }
 0x835   :  { %847 = vadd.xlane.f32.xlu2 %v846_v52 }
 0x891   :  { %v916_v54 = vpop.f32.mrf.mxu2 }
 0x892   :  { %v2789_v56 = vadd.f32 %v2786_v53, %v916_v54 }
 0x894   :  { %v2792_v57 = vmul.f32 0.70710677, %v2789_v56  ;;  %v922_v52 = vmul.f32 0.5, %v2789_v56 }
 0x896   :  { %v926_v60 = vand.u32 2147483647, %v2792_v57  ;;  %vm992_vm5 = vcmp.ge.f32.partialorder %v2792_v57, 0.0 }
 0x898   :  { %v928_v61 = vmul.f32 0.3275911, %v926_v60  ;;  %v980_v25 = vsub.f32 0.0, %v926_v60 }
 0x89a   :  { %v930_v62 = vadd.f32 1.0, %v928_v61  ;;  %v982_v28 = vmul.f32 %v980_v25, %v926_v60 }
 0x89c   :  { %2381 = vrcp.f32 %v930_v62  ;;  %v943_v9 = vand.u32 2147483648, %v930_v62  ;;  %v941_v13 = vand.u32 2147483647, %v930_v62  ;;  %vm937_vm14 = vweird.f32 %v930_v62 }
 0x89d   :  { %v984_v32 = vmul.f32 1.442695, %v982_v28 }
 0x89e   :  { %v944_v20 = vor.u32 1.1754944e-38, %v943_v9  ;;  %vm942_vm1 = vcmp.eq.f32.partialorder %v941_v13, 8.507059e+37 }
 0x8a2   :  { %v2382_v3 = vpop.eup %2381 }
 0x8a3   :  { %v933_v5 = vmul.f32 %v2382_v3, %v930_v62  ;;  %vm938_vm13 = vweird.f32 %v2382_v3 }
 0x8a4   :  { %vm939_vm15 = vmor %vm937_vm14, %vm938_vm13 }
 0x8a5   :  { %v934_v8 = vsub.f32 1.0, %v933_v5 }
 0x8a7   :  { %v935_v12 = vmul.f32 %v2382_v3, %v934_v8 }
 0x8a8   :  { %v848_v14 = vpop.xlane.xlu2 %847 }
 0x8a9   :  { %v936_v17 = vadd.f32 %v2382_v3, %v935_v12  ;;  %v850_v19 = vmul.f32 %v848_v14, %v2559_v10 }
 0x8ab   :  { %v940_v22 = vsel %vm939_vm15, %v2382_v3, %v936_v17  ;;  %v852_v23 = vadd.f32 1e-05, %v850_v19 }
 0x8ac   :  { %v945_v24 = vsel %vm942_vm1, %v944_v20, %v940_v22 }
 0x8ad   :  { %v962_v27 = vmul.f32 1.0614054, %v945_v24  ;;  %2383 = vrsqrt.f32 %v852_v23  ;;  %vm869_vm3 = vweird.f32 %v852_v23 }
 0x8ae   :  { %2385 = vpow2.f32 %v984_v32 }
 0x8af   :  { %v964_v0 = vadd.f32 -1.4531521, %v962_v27 }
 0x8b1   :  { %v966_v29 = vmul.f32 %v964_v0, %v945_v24 }
 0x8b3   :  { %v2384_v59 = vpop.eup %2383  ;;  %v968_v30 = vadd.f32 1.4214138, %v966_v29 }
 0x8b4   :  { %v864_v33 = vmul.f32 %v2384_v59, %v852_v23  ;;  %vm870_vm2 = vweird.f32 %v2384_v59  ;;  %v2386_v40 = vpop.eup %2385 }
 0x8b5   :  { %v970_v26 = vmul.f32 %v968_v30, %v945_v24  ;;  %vm871_vm4 = vmor %vm869_vm3, %vm870_vm2 }
 0x8b6   :  { %v865_v2 = vmul.f32 %v2384_v59, %v864_v33 }
 0x8b7   :  { %v972_v34 = vadd.f32 -0.28449672, %v970_v26 }
 0x8b8   :  { %v866_v35 = vmul.f32 0.5, %v865_v2 }
 0x8b9   :  { %v974_v36 = vmul.f32 %v972_v34, %v945_v24 }
 0x8ba   :  { %v867_v37 = vsub.f32 1.5, %v866_v35 }
 0x8bb   :  { %v976_v38 = vadd.f32 0.2548296, %v974_v36 }
 0x8bc   :  { %v868_v39 = vmul.f32 %v2384_v59, %v867_v37 }
 0x8bd   :  { %v978_v55 = vmul.f32 %v976_v38, %v945_v24 }
 0x8be   :  { %v872_v41 = vsel %vm871_vm4, %v2384_v59, %v868_v39 }
 0x8bf   :  { %v988_v42 = vmul.f32 %v2386_v40, %v978_v55  ;;  %v874_v44 = vmul.f32 %v872_v41, %v2778_v50  ;;  %v2231_v41 = vld [vmem:[%s3179_s3 + $0x38] sm:$0xff] }
 0x8c0   :  { %1132 = vmatpush.msra.mxu0 %v2231_v41 }
 0x8c1   :  { %v990_v45 = vsub.f32 1.0, %v988_v42  ;;  %v879_v47 = vmul.f32 %v2766_v43, %v874_v44  ;;  %v2230_v42 = vld [vmem:[%s3179_s3 + $0x30] sm:$0xff]  ;;  %v2229_v44 = vld [vmem:[%s3179_s3 + $0x28] sm:$0xff] }
 0x8c2   :  { %1133 = vmatpush.msra.mxu0 %v2230_v42 }
 0x8c3   :  { %v994_v48 = vsub.f32 0.0, %v990_v45  ;;  %v884_v49 = vadd.f32 %v2771_v46, %v879_v47  ;;  %v2331_v46 = vld [vmem:[%s3187_s12] ss:$0 sm:$0xff] }
 0x8c4   :  { %1134 = vmatpush.msra.mxu0 %v2229_v44 }
 0x8c5   :  { %v996_v58 = vsel %vm992_vm5, %v990_v45, %v994_v48  ;;  %2223 = vmatmul.msk.f32.gmra.mxu2 %vm65_vm0, %v884_v49 }
 0x8c6   :  { %v998_v51 = vadd.f32 1.0, %v996_v58 }
 0x8c8   :  { %v1000_v54 = vmul.f32 %v998_v51, %v922_v52 }
 0x8cd   :  { %2224 = vmatmul.msk.f32.vlgmr.msrb.gmra.mxu2 %vm1014_vm6, %v1000_v54 }
 0x948   :  { %v919_v60 = vpop.f32.mrf.mxu2 }
 0x949   :  { %v920_v50 = vadd.f32 %v2786_v53, %v919_v60 }
 0x94b   :  { %v925_v61 = vmul.f32 0.70710677, %v920_v50  ;;  %v923_v32 = vmul.f32 0.5, %v920_v50  ;;  %v2324_v50 = vld [vmem:[%s3208_s24 + $0x1] ss:$0 sm:$0xff] }
 0x94d   :  { %v927_v43 = vand.u32 2147483647, %v925_v61  ;;  %vm993_vm13 = vcmp.ge.f32.partialorder %v925_v61, 0.0 }
 0x94f   :  { %v929_v57 = vmul.f32 0.3275911, %v927_v43  ;;  %v981_v14 = vsub.f32 0.0, %v927_v43 }
 0x950   :  { %v1038_v62 = vpop.f32.mrf.mxu2 }
 0x951   :  { %v931_v63 = vadd.f32 1.0, %v929_v57  ;;  %v1039_v1 = vadd.f32 %v2331_v46, %v1038_v62  ;;  %v983_v17 = vmul.f32 %v981_v14, %v927_v43  ;;  %v2325_v43 = vld [vmem:[%s3177_s2 + $0x1] ss:$0 sm:$0xff]  ;;  %s3211_s2 = smov 112  }
 0x953   :  { %2387 = vrcp.f32 %v931_v63  ;;  %v2832_v56 = vadd.f32 %v1039_v1, %v2736_v18  ;;  %v958_v6 = vand.u32 2147483648, %v931_v63  ;;  %v956_v9 = vand.u32 2147483647, %v931_v63 }
 0x954   :  { %vm952_vm10 = vweird.f32 %v931_v63  ;;  %v986_v21 = vmul.f32 1.442695, %v983_v17 }
 0x955   :  { %v1050_v3 = vsel %vm65_vm0, %v2832_v56, 0.0  ;;  %v959_v12 = vor.u32 1.1754944e-38, %v958_v6  ;;  %vm957_vm12 = vcmp.eq.f32.partialorder %v956_v9, 8.507059e+37 }
 0x956   :  { %1051 = vadd.xlane.f32.xlu2 %v1050_v3  ;;  %2389 = vpow2.f32 %v986_v21 }
 0x959   :  { %v2388_v4 = vpop.eup %2387 }
 0x95a   :  { %v948_v53 = vmul.f32 %v2388_v4, %v931_v63  ;;  %vm953_vm7 = vweird.f32 %v2388_v4 }
 0x95b   :  { %vm954_vm11 = vmor %vm952_vm10, %vm953_vm7 }
 0x95c   :  { %v949_v5 = vsub.f32 1.0, %v948_v53  ;;  %v2390_v0 = vpop.eup %2389 }
 0x95e   :  { %v950_v8 = vmul.f32 %v2388_v4, %v949_v5  ;;  %v2332_v5 = vld [vmem:[%s3178_s4 + $0x1] ss:$0 sm:$0xff]  ;;  %s3212_s4 = smov 72  }
 0x960   :  { %v951_v11 = vadd.f32 %v2388_v4, %v950_v8 }
 0x962   :  { %v955_v13 = vsel %vm954_vm11, %v2388_v4, %v951_v11 }
 0x963   :  { %v960_v18 = vsel %vm957_vm12, %v959_v12, %v955_v13 }
 0x964   :  { %v963_v15 = vmul.f32 1.0614054, %v960_v18 }
 0x966   :  { %v965_v16 = vadd.f32 -1.4531521, %v963_v15 }
 0x968   :  { %v967_v19 = vmul.f32 %v965_v16, %v960_v18 }
 0x96a   :  { %v969_v20 = vadd.f32 1.4214138, %v967_v19 }
 0x96c   :  { %v971_v22 = vmul.f32 %v969_v20, %v960_v18 }
 0x96e   :  { %v973_v23 = vadd.f32 -0.28449672, %v971_v22 }
 0x970   :  { %v975_v24 = vmul.f32 %v973_v23, %v960_v18 }
 0x972   :  { %v977_v25 = vadd.f32 0.2548296, %v975_v24 }
 0x974   :  { %v979_v27 = vmul.f32 %v977_v25, %v960_v18 }
 0x976   :  { %v989_v28 = vmul.f32 %v2390_v0, %v979_v27 }
 0x978   :  { %v991_v29 = vsub.f32 1.0, %v989_v28 }
 0x97a   :  { %v995_v59 = vsub.f32 0.0, %v991_v29 }
 0x97c   :  { %v997_v30 = vsel %vm993_vm13, %v991_v29, %v995_v59 }
 0x97d   :  { %v999_v33 = vadd.f32 1.0, %v997_v30 }
 0x97f   :  { %v1001_v26 = vmul.f32 %v999_v33, %v923_v32 }
 0x981   :  { %2225 = vmatmul.msk.f32.gmra.mxu2 %vm1014_vm6, %v1001_v26 }
 0x9c9   :  { %v1052_v2 = vpop.xlane.xlu2 %1051 }
 0x9ca   :  { %v1056_v34 = vmul.f32 %v1052_v2, %v2559_v10 }
 0x9cc   :  { %v1058_v35 = vsub.f32 %v2832_v56, %v1056_v34 }
 0x9ce   :  { %v1060_v36 = vmul.f32 %v1058_v35, %v1058_v35 }
 0x9d0   :  { %v1062_v37 = vsel %vm65_vm0, %v1060_v36, 0.0 }
 0x9d1   :  { %1063 = vadd.xlane.f32.xlu2 %v1062_v37 }
 0xa04   :  { %v1041_v38 = vpop.f32.mrf.mxu2 }
 0xa05   :  { %v1042_v39 = vadd.f32 %v2331_v46, %v1041_v38 }
 0xa07   :  { %v2841_v55 = vadd.f32 %v1042_v39, %v2746_v31  ;;  %v2228_v31 = vld [vmem:[%s3179_s3 + $0x20] sm:$0xff] }
 0xa08   :  { %1135 = vmatpush.msra.mxu0 %v2228_v31 }
 0xa09   :  { %v1053_v40 = vsel %vm65_vm0, %v2841_v55, 0.0 }
 0xa0a   :  { %1054 = vadd.xlane.f32.xlu2 %v1053_v40 }
 0xa44   :  { %v1064_v45 = vpop.xlane.xlu2 %1063 }
 0xa45   :  { %v1068_v47 = vmul.f32 %v1064_v45, %v2559_v10 }
 0xa47   :  { %v1070_v48 = vadd.f32 1e-05, %v1068_v47 }
 0xa49   :  { %2391 = vrsqrt.f32 %v1070_v48  ;;  %vm1078_vm15 = vweird.f32 %v1070_v48 }
 0xa4f   :  { %v2392_v49 = vpop.eup %2391 }
 0xa50   :  { %v1073_v58 = vmul.f32 %v2392_v49, %v1070_v48  ;;  %vm1079_vm14 = vweird.f32 %v2392_v49 }
 0xa51   :  { %vm1080_vm1 = vmor %vm1078_vm15, %vm1079_vm14 }
 0xa52   :  { %v1074_v51 = vmul.f32 %v2392_v49, %v1073_v58 }
 0xa54   :  { %v1075_v52 = vmul.f32 0.5, %v1074_v51 }
 0xa56   :  { %v1076_v54 = vsub.f32 1.5, %v1075_v52 }
 0xa58   :  { %v1077_v60 = vmul.f32 %v2392_v49, %v1076_v54 }
 0xa5a   :  { %v1081_v61 = vsel %vm1080_vm1, %v2392_v49, %v1077_v60 }
 0xa5b   :  { %v1092_v46 = vmul.f32 %v1081_v61, %v1058_v35 }
 0xa5d   :  { %v1097_v57 = vmul.f32 %v2324_v50, %v1092_v46 }
 0xa5f   :  { %v1102_v62 = vadd.f32 %v2325_v43, %v1097_v57 }
 0xa61   :  { %2233 = vmatmul.msk.f32.vlgmr.msra.gmra.mxu0 %vm65_vm0, %v1102_v62 }
 0xa7d   :  { %v1055_v63 = vpop.xlane.xlu2 %1054 }
 0xa7e   :  { %v1057_v1 = vmul.f32 %v1055_v63, %v2559_v10 }
 0xa80   :  { %v1059_v3 = vsub.f32 %v2841_v55, %v1057_v1 }
 0xa82   :  { %v1061_v4 = vmul.f32 %v1059_v3, %v1059_v3 }
 0xa84   :  { %v1065_v53 = vsel %vm65_vm0, %v1061_v4, 0.0 }
 0xa85   :  { %1066 = vadd.xlane.f32.xlu2 %v1065_v53 }
 0xade   :  { %v1137_v6 = vpop.f32.mrf.mxu0 }
 0xadf   :  { %v2871_v8 = vadd.f32 %v2332_v5, %v1137_v6 }
 0xae1   :  { %1284 = vrot.lane.b32.xlu1 %v2871_v8, %s2444_s29  ;;  %1151 = vrot.lane.b32.xlu0 %v2871_v8, %s2445_s0  ;;  %v2878_v9 = vmul.f32 0.35355338, %v2871_v8 }
 0xae3   :  { %1282 = vrot.lane.b32.xlu2 %v2878_v9, %s2446_s30 }
 0xaf8   :  { %v1067_v11 = vpop.xlane.xlu2 %1066 }
 0xaf9   :  { %v1069_v12 = vmul.f32 %v1067_v11, %v2559_v10 }
 0xafb   :  { %v1071_v13 = vadd.f32 1e-05, %v1069_v12 }
 0xafd   :  { %2393 = vrsqrt.f32 %v1071_v13  ;;  %vm1088_vm3 = vweird.f32 %v1071_v13 }
 0xb03   :  { %v2394_v14 = vpop.eup %2393 }
 0xb04   :  { %v1083_v18 = vmul.f32 %v2394_v14, %v1071_v13  ;;  %vm1089_vm2 = vweird.f32 %v2394_v14  ;;  %v2236_v13 = vld [vmem:[%s3180_s5 + $0x28] sm:$0xff] }
 0xb05   :  { %vm1090_vm4 = vmor %vm1088_vm3, %vm1089_vm2 }
 0xb06   :  { %v1084_v15 = vmul.f32 %v2394_v14, %v1083_v18 }
 0xb08   :  { %v1085_v16 = vmul.f32 0.5, %v1084_v15 }
 0xb0a   :  { %v1086_v17 = vsub.f32 1.5, %v1085_v16 }
 0xb0c   :  { %v1087_v19 = vmul.f32 %v2394_v14, %v1086_v17 }
 0xb0e   :  { %v1091_v20 = vsel %vm1090_vm4, %v2394_v14, %v1087_v19 }
 0xb0f   :  { %v1093_v21 = vmul.f32 %v1091_v20, %v1059_v3 }
 0xb11   :  { %v1098_v22 = vmul.f32 %v2324_v50, %v1093_v21 }
 0xb13   :  { %v1103_v23 = vadd.f32 %v2325_v43, %v1098_v22 }
 0xb15   :  { %2234 = vmatmul.msk.f32.gmra.mxu0 %vm65_vm0, %v1103_v23 }
 0xb3d   :  { %v1283_v27 = vpop.permute.xlu2 %1282 }
 0xb53   :  { %v1285_v24 = vpop.permute.xlu1 %1284  ;;  %v1152_v25 = vpop.permute.xlu0 %1151 }
 0xb54   :  { %2239 = vmatpush.xpose.msk.msra.mxu3 %vm173_vm8, %v1152_v25 }
 0xb57   :  { %2240 = vmatmul.msk.f32.vlgmr.msra.gmra.mxu3 %vm173_vm8, %v2878_v9 }
 0xb58   :  { %2245 = vmatpush.xpose.msk.msrb.mxu3 %vm173_vm8, %v1285_v24 }
 0xb5c   :  { %1435 = vmatpush.msra.mxu3 %v2236_v13 }
 0xb5f   :  { %2246 = vmatmul.msk.f32.vlgmr.msrb.gmra.mxu3 %vm173_vm8, %v1283_v27 }
 0xb92   :  { %v1140_v0 = vpop.f32.mrf.mxu0 }
 0xb93   :  { %v2889_v28 = vadd.f32 %v2332_v5, %v1140_v0 }
 0xb95   :  { %1179 = vrot.lane.b32.xlu0 %v2889_v28, %s2445_s0  ;;  %v2904_v2 = vmul.f32 0.35355338, %v2889_v28 }
 0xb9d   :  { %1230 = vrot.lane.b32.xlu0 %v2871_v8, %s2447_s18 }
 0xbda   :  { %v1175_v29 = vpop.f32.mrf.mxu3 }
 0xbdb   :  { %v1206_v59 = vsel %vm2624_vm9, -inf, %v1175_v29 }
 0xbdc   :  { %v1208_v30 = vsel %vm173_vm8, %v1206_v59, -inf }
 0xbdd   :  { %1209 = vmax.xlane.f32.xlu1 %v1208_v30 }
 0xbe2   :  { %v1307_v32 = vpop.f32.mrf.mxu3 }
 0xbe3   :  { %v1338_v33 = vsel %vm2624_vm9, -inf, %v1307_v32 }
 0xbe4   :  { %v1340_v26 = vsel %vm173_vm8, %v1338_v33, -inf }
 0xbe5   :  { %1341 = vmax.xlane.f32.xlu2 %v1340_v26 }
 0xbf6   :  { %1312 = vrot.lane.b32.xlu1 %v2889_v28, %s2444_s29  ;;  %s3213_s29 = smov 104  }
 0xbfd   :  { %1310 = vrot.lane.b32.xlu2 %v2904_v2, %s2446_s30 }
 0xbfe   :  { %1474 = vrot.lane.b32.xlu1 %v2871_v8, %s2448_s19 }
 0xc05   :  { %1362 = vrot.lane.b32.xlu2 %v2871_v8, %s2450_s20 }
 0xc07   :  { %v1180_v34 = vpop.permute.xlu0 %1179 }
 0xc08   :  { %2241 = vmatpush.xpose.msk.msrb.mxu1 %vm173_vm8, %v1180_v34 }
 0xc0b   :  { %2242 = vmatmul.msk.f32.vlgmr.msrb.gmra.mxu1 %vm173_vm8, %v2904_v2 }
 0xc0f   :  { %v1231_v35 = vpop.permute.xlu0 %1230 }
 0xc10   :  { %1251 = vmatpush.msra.mxu2 %v1231_v35 }
 0xc50   :  { %v1210_v36 = vpop.xlane.xlu1 %1209 }
 0xc51   :  { %v1214_v37 = vsub.f32 %v1206_v59, %v1210_v36  ;;  %v2235_v36 = vld [vmem:[%s3180_s5 + $0x20] sm:$0xff] }
 0xc53   :  { %v1216_v38 = vmul.f32 1.442695, %v1214_v37 }
 0xc55   :  { %2395 = vpow2.f32 %v1216_v38 }
 0xc58   :  { %v1342_v39 = vpop.xlane.xlu2 %1341 }
 0xc59   :  { %v1346_v40 = vsub.f32 %v1338_v33, %v1342_v39 }
 0xc5b   :  { %v2396_v41 = vpop.eup %2395  ;;  %v1348_v42 = vmul.f32 1.442695, %v1346_v40 }
 0xc5c   :  { %v1220_v44 = vsel %vm173_vm8, %v2396_v41, 0.0 }
 0xc5d   :  { %2397 = vpow2.f32 %v1348_v42  ;;  %1221 = vadd.xlane.f32.xlu0 %v1220_v44 }
 0xc60   :  { %v1311_v31 = vpop.permute.xlu2 %1310 }
 0xc63   :  { %v2398_v45 = vpop.eup %2397 }
 0xc64   :  { %v1352_v47 = vsel %vm173_vm8, %v2398_v45, 0.0 }
 0xc65   :  { %1353 = vadd.xlane.f32.xlu0 %v1352_v47 }
 0xc68   :  { %v1313_v48 = vpop.permute.xlu1 %1312  ;;  %v1363_v49 = vpop.permute.xlu2 %1362 }
 0xc69   :  { %2247 = vmatpush.xpose.msk.msra.mxu1 %vm173_vm8, %v1313_v48  ;;  %1383 = vmatpush.msrb.mxu2 %v1363_v49 }
 0xc6c   :  { %2248 = vmatmul.msk.f32.vlgmr.msra.gmra.mxu1 %vm173_vm8, %v1311_v31 }
 0xc70   :  { %v1475_v43 = vpop.permute.xlu1 %1474 }
 0xc79   :  { %1472 = vrot.lane.b32.xlu0 %v2878_v9, %s3211_s2 }
 0xc81   :  { %1256 = vrot.lane.b32.xlu0 %v2889_v28, %s2447_s18  ;;  %s3214_s18 = smov 48  }
 0xc88   :  { %v1203_v58 = vpop.f32.mrf.mxu1 }
 0xc89   :  { %v1207_v51 = vsel %vm2624_vm9, -inf, %v1203_v58 }
 0xc8a   :  { %v1211_v52 = vsel %vm173_vm8, %v1207_v51, -inf }
 0xc8b   :  { %1212 = vmax.xlane.f32.xlu2 %v1211_v52 }
 0xcd0   :  { %v1222_v54 = vpop.xlane.xlu0 %1221 }
 0xcd1   :  { %2399 = vrcp.f32 %v1222_v54 }
 0xcd7   :  { %v2400_v60 = vpop.eup %2399 }
 0xcd8   :  { %v1228_v50 = vmul.f32 %v2400_v60, %v2396_v41  ;;  %v1354_v61 = vpop.xlane.xlu0 %1353 }
 0xcd9   :  { %2401 = vrcp.f32 %v1354_v61 }
 0xcda   :  { %2243 = vmatmul.msk.f32.vlgmr.msra.gmra.mxu2 %vm173_vm8, %v1228_v50 }
 0xcdb   :  { %2255 = vmatpush.xpose.msk.msra.mxu2 %vm173_vm8, %v1475_v43 }
 0xcdf   :  { %v2402_v46 = vpop.eup %2401 }
 0xce0   :  { %v1360_v57 = vmul.f32 %v2402_v46, %v2398_v45 }
 0xce2   :  { %2249 = vmatmul.msk.f32.vlgmr.msrb.gmra.mxu2 %vm173_vm8, %v1360_v57 }
 0xce9   :  { %v1335_v62 = vpop.f32.mrf.mxu1 }
 0xcea   :  { %v1339_v63 = vsel %vm2624_vm9, -inf, %v1335_v62 }
 0xceb   :  { %v1473_v1 = vpop.permute.xlu0 %1472  ;;  %v1343_v3 = vsel %vm173_vm8, %v1339_v63, -inf }
 0xcec   :  { %1344 = vmax.xlane.f32.xlu0 %v1343_v3  ;;  %2256 = vmatmul.msk.f32.vlgmr.msra.gmra.mxu2 %vm173_vm8, %v1473_v1 }
 0xcf3   :  { %v1257_v4 = vpop.permute.xlu0 %1256 }
 0xcf4   :  { %1277 = vmatpush.msrb.mxu0 %v1257_v4 }
 0xcfe   :  { %v1213_v53 = vpop.xlane.xlu2 %1212 }
 0xcff   :  { %v1215_v5 = vsub.f32 %v1207_v51, %v1213_v53 }
 0xd00   :  { %1502 = vrot.lane.b32.xlu0 %v2889_v28, %s2448_s19 }
 0xd01   :  { %v1218_v6 = vmul.f32 1.442695, %v1215_v5 }
 0xd03   :  { %2403 = vpow2.f32 %v1218_v6 }
 0xd08   :  { %1637 = vrot.lane.b32.xlu0 %v2871_v8, %s3212_s4 }
 0xd09   :  { %v2404_v11 = vpop.eup %2403 }
 0xd0a   :  { %v1223_v12 = vsel %vm173_vm8, %v2404_v11, 0.0 }
 0xd0b   :  { %1224 = vadd.xlane.f32.xlu1 %v1223_v12 }
 0xd10   :  { %1635 = vrot.lane.b32.xlu0 %v2878_v9, %s3213_s29 }
 0xd5d   :  { %v1253_v14 = vpop.f32.mrf.mxu2 }
 0xd5f   :  { %v1345_v18 = vpop.xlane.xlu0 %1344 }
 0xd60   :  { %v1347_v15 = vsub.f32 %v1339_v63, %v1345_v18  ;;  %v2237_v63 = vld [vmem:[%s3180_s5 + $0x30] sm:$0xff] }
 0xd61   :  { %1625 = vmatpush.msrb.mxu3 %v2237_v63  ;;  %v2274_v63 = vld [vmem:[%s3185_s9 + $0x20] sm:$0xff] }
 0xd62   :  { %v1350_v16 = vmul.f32 1.442695, %v1347_v15 }
 0xd64   :  { %2405 = vpow2.f32 %v1350_v16 }
 0xd65   :  { %v1385_v17 = vpop.f32.mrf.mxu2 }
 0xd66   :  { %2251 = vmatmul.msk.f32.vlgmr.msra.gmra.mxu3 %vm173_vm8, %v1385_v17 }
 0xd6a   :  { %v2406_v19 = vpop.eup %2405 }
 0xd6b   :  { %v1355_v20 = vsel %vm173_vm8, %v2406_v19, 0.0 }
 0xd6c   :  { %1356 = vadd.xlane.f32.xlu1 %v1355_v20 }
 0xd6f   :  { %v1497_v21 = vpop.f32.mrf.mxu2 }
 0xd70   :  { %v1528_v9 = vsel %vm2624_vm9, -inf, %v1497_v21 }
 0xd71   :  { %v1530_v22 = vsel %vm173_vm8, %v1528_v9, -inf }
 0xd72   :  { %v1503_v23 = vpop.permute.xlu0 %1502  ;;  %1531 = vmax.xlane.f32.xlu2 %v1530_v22 }
 0xd7a   :  { %v1638_v24 = vpop.permute.xlu0 %1637 }
 0xd7b   :  { %2263 = vmatpush.xpose.msk.msrb.mxu1 %vm173_vm8, %v1638_v24  ;;  %v2238_v24 = vld [vmem:[%s3180_s5 + $0x38] sm:$0xff] }
 0xd7e   :  { %v1225_v25 = vpop.xlane.xlu1 %1224 }
 0xd7f   :  { %2407 = vrcp.f32 %v1225_v25 }
 0xd82   :  { %v1636_v27 = vpop.permute.xlu0 %1635 }
 0xd83   :  { %2264 = vmatmul.msk.f32.vlgmr.msrb.gmra.mxu1 %vm173_vm8, %v1636_v27 }
 0xd85   :  { %v2408_v0 = vpop.eup %2407  ;;  %1500 = vrot.lane.b32.xlu1 %v2904_v2, %s3211_s2 }
 0xd86   :  { %v1229_v29 = vmul.f32 %v2408_v0, %v2404_v11 }
 0xd88   :  { %2244 = vmatmul.msk.f32.vlgmr.msrb.gmra.mxu0 %vm173_vm8, %v1229_v29 }
 0xd8a   :  { %1388 = vrot.lane.b32.xlu2 %v2889_v28, %s2450_s20  ;;  %s3215_s20 = smov 40  }
 0xd92   :  { %1552 = vrot.lane.b32.xlu2 %v2871_v8, %s3214_s18 }
 0xd9a   :  { %1665 = vrot.lane.b32.xlu2 %v2889_v28, %s3212_s4 }
 0xddf   :  { %v1357_v59 = vpop.xlane.xlu1 %1356 }
 0xde0   :  { %2409 = vrcp.f32 %v1357_v59 }
 0xde5   :  { %v1532_v30 = vpop.xlane.xlu2 %1531 }
 0xde6   :  { %v1536_v32 = vsub.f32 %v1528_v9, %v1532_v30  ;;  %v2410_v26 = vpop.eup %2409 }
 0xde7   :  { %v1361_v34 = vmul.f32 %v2410_v26, %v2406_v19 }
 0xde8   :  { %v1538_v33 = vmul.f32 1.442695, %v1536_v32 }
 0xde9   :  { %v1437_v32 = vpop.f32.mrf.mxu3 }
 0xdea   :  { %2411 = vpow2.f32 %v1538_v33 }
 0xded   :  { %v1389_v35 = vpop.permute.xlu2 %1388 }
 0xdee   :  { %1409 = vmatpush.msra.mxu0 %v1389_v35 }
 0xdef   :  { %2250 = vmatmul.msk.f32.vlgmr.msra.gmra.mxu0 %vm173_vm8, %v1361_v34 }
 0xdf0   :  { %v2412_v37 = vpop.eup %2411  ;;  %1464 = vmatpush.msrb.mxu0 %v2235_v36 }
 0xdf1   :  { %v1542_v38 = vsel %vm173_vm8, %v2412_v37, 0.0 }
 0xdf2   :  { %2257 = vmatpush.xpose.msk.msra.mxu0 %vm173_vm8, %v1503_v23  ;;  %1543 = vadd.xlane.f32.xlu1 %v1542_v38  ;;  %v2333_v38 = vld [vmem:[%s3181_s6 + $0x1] ss:$0 sm:$0xff] }
 0xdf5   :  { %v1553_v39 = vpop.permute.xlu2 %1552 }
 0xdf6   :  { %1573 = vmatpush.msrb.mxu2 %v1553_v39 }
 0xdf7   :  { %2253 = vmatmul.msk.f32.vlgmr.msrb.gmra.mxu0 %vm173_vm8, %v1253_v14  ;;  %v1501_v45 = vpop.permute.xlu1 %1500 }
 0xdfd   :  { %v1666_v40 = vpop.permute.xlu2 %1665 }
 0xdfe   :  { %2265 = vmatpush.xpose.msk.msra.mxu2 %vm173_vm8, %v1666_v40 }
 0xe00   :  { %v1660_v41 = vpop.f32.mrf.mxu1 }
 0xe01   :  { %v1691_v42 = vsel %vm2624_vm9, -inf, %v1660_v41 }
 0xe02   :  { %v1693_v44 = vsel %vm173_vm8, %v1691_v42, -inf }
 0xe03   :  { %1694 = vmax.xlane.f32.xlu0 %v1693_v44 }
 0xe05   :  { %v1279_v31 = vpop.f32.mrf.mxu0 }
 0xe06   :  { %2254 = vmatmul.msk.f32.gmra.mxu0 %vm173_vm8, %v1279_v31 }
 0xe0b   :  { %1663 = vrot.lane.b32.xlu1 %v2904_v2, %s3213_s29 }
 0xe0e   :  { %2258 = vmatmul.msk.f32.vlgmr.msra.gmra.mxu0 %vm173_vm8, %v1501_v45 }
 0xe65   :  { %v1544_v47 = vpop.xlane.xlu1 %1543 }
 0xe66   :  { %2413 = vrcp.f32 %v1544_v47 }
 0xe6c   :  { %v2414_v48 = vpop.eup %2413  ;;  %v1411_v49 = vpop.f32.mrf.mxu0 }
 0xe6d   :  { %v1550_v58 = vmul.f32 %v2414_v48, %v2412_v37  ;;  %2252 = vmatmul.msk.f32.gmra.mxu3 %vm173_vm8, %v1411_v49 }
 0xe6f   :  { %2259 = vmatmul.msk.f32.vlgmr.msrb.gmra.mxu2 %vm173_vm8, %v1550_v58 }
 0xe70   :  { %1788 = vmatpush.msrb.mxu2 %v2238_v24 }
 0xe74   :  { %v2976_v60 = vpop.f32.mrf.mxu0 }
 0xe75   :  { %v1467_v34 = vadd.f32 %v2976_v60, %v1437_v32 }
 0xe76   :  { %v1695_v51 = vpop.xlane.xlu0 %1694 }
 0xe77   :  { %v1699_v52 = vsub.f32 %v1691_v42, %v1695_v51 }
 0xe79   :  { %v1701_v54 = vmul.f32 1.442695, %v1699_v52 }
 0xe7b   :  { %2415 = vpow2.f32 %v1701_v54 }
 0xe7d   :  { %v1664_v50 = vpop.permute.xlu1 %1663 }
 0xe7e   :  { %2266 = vmatmul.msk.f32.vlgmr.msra.gmra.mxu2 %vm173_vm8, %v1664_v50 }
 0xe81   :  { %v2416_v2 = vpop.eup %2415 }
 0xe82   :  { %v1705_v61 = vsel %vm173_vm8, %v2416_v2, 0.0 }
 0xe83   :  { %v2980_v43 = vpop.f32.mrf.mxu0  ;;  %1706 = vadd.xlane.f32.xlu0 %v1705_v61 }
 0xe8b   :  { %v1525_v46 = vpop.f32.mrf.mxu0 }
 0xe8c   :  { %v1529_v57 = vsel %vm2624_vm9, -inf, %v1525_v46  ;;  %v2277_v46 = vld [vmem:[%s3185_s9 + $0x38] sm:$0xff] }
 0xe8d   :  { %v1533_v62 = vsel %vm173_vm8, %v1529_v57, -inf }
 0xe8e   :  { %1534 = vmax.xlane.f32.xlu2 %v1533_v62  ;;  %v2275_v62 = vld [vmem:[%s3185_s9 + $0x28] sm:$0xff] }
 0xe97   :  { %1715 = vrot.lane.b32.xlu0 %v2871_v8, %s3215_s20 }
 0xef0   :  { %v1440_v33 = vpop.f32.mrf.mxu3 }
 0xef1   :  { %v1470_v44 = vadd.f32 %v2980_v43, %v1440_v33 }
 0xef2   :  { %v1575_v1 = vpop.f32.mrf.mxu2 }
 0xef3   :  { %2261 = vmatmul.msk.f32.vlgmr.msrb.gmra.mxu3 %vm173_vm8, %v1575_v1 }
 0xef6   :  { %v1707_v17 = vpop.xlane.xlu0 %1706 }
 0xf01   :  { %v1535_v3 = vpop.xlane.xlu2 %1534  ;;  %v1688_v4 = vpop.f32.mrf.mxu2 }
 0xf02   :  { %v1537_v53 = vsub.f32 %v1529_v57, %v1535_v3  ;;  %v1692_v5 = vsel %vm2624_vm9, -inf, %v1688_v4  ;;  %v2276_v57 = vld [vmem:[%s3185_s9 + $0x30] sm:$0xff] }
 0xf03   :  { %v1696_v11 = vsel %vm173_vm8, %v1692_v5, -inf }
 0xf04   :  { %v1540_v6 = vmul.f32 1.442695, %v1537_v53  ;;  %1697 = vmax.xlane.f32.xlu1 %v1696_v11 }
 0xf06   :  { %2417 = vpow2.f32 %v1540_v6 }
 0xf09   :  { %v1716_v9 = vpop.permute.xlu0 %1715 }
 0xf0c   :  { %v2418_v8 = vpop.eup %2417 }
 0xf0d   :  { %v1545_v12 = vsel %vm173_vm8, %v2418_v8, 0.0 }
 0xf0e   :  { %1546 = vadd.xlane.f32.xlu2 %v1545_v12 }
 0xf1d   :  { %1578 = vrot.lane.b32.xlu1 %v2889_v28, %s3214_s18 }
 0xf76   :  { %v1627_v26 = vpop.f32.mrf.mxu3 }
 0xf77   :  { %v1698_v13 = vpop.xlane.xlu1 %1697  ;;  %v1633_v35 = vadd.f32 %v1627_v26, %v1467_v34 }
 0xf78   :  { %v1700_v14 = vsub.f32 %v1692_v5, %v1698_v13  ;;  %v2334_v13 = vld [vmem:[%s3182_s7 + $0x1] ss:$0 sm:$0xff] }
 0xf7a   :  { %v1703_v18 = vmul.f32 1.442695, %v1700_v14 }
 0xf7c   :  { %2419 = vpow2.f32 %v1703_v18 }
 0xf81   :  { %v1547_v16 = vpop.xlane.xlu2 %1546 }
 0xf82   :  { %v2420_v15 = vpop.eup %2419  ;;  %2421 = vrcp.f32 %v1547_v16 }
 0xf83   :  { %v1708_v7 = vsel %vm173_vm8, %v2420_v15, 0.0  ;;  %2423 = vrcp.f32 %v1707_v17 }
 0xf84   :  { %1709 = vadd.xlane.f32.xlu2 %v1708_v7 }
 0xf88   :  { %v2422_v19 = vpop.eup %2421 }
 0xf89   :  { %v1551_v20 = vmul.f32 %v2422_v19, %v2418_v8  ;;  %v2424_v22 = vpop.eup %2423 }
 0xf8a   :  { %v1713_v23 = vmul.f32 %v2424_v22, %v2416_v2 }
 0xf8f   :  { %v1579_v21 = vpop.permute.xlu1 %1578 }
 0xf90   :  { %1599 = vmatpush.msrb.mxu0 %v1579_v21 }
 0xf91   :  { %2260 = vmatmul.msk.f32.vlgmr.msrb.gmra.mxu0 %vm173_vm8, %v1551_v20 }
 0xf92   :  { %1736 = vmatpush.msra.mxu0 %v1716_v9 }
 0xf94   :  { %1893 = vmatpush.msrb.mxu0 %v2277_v46 }
 0xf96   :  { %1894 = vmatpush.msrb.mxu0 %v2276_v57 }
 0xf98   :  { %1895 = vmatpush.msrb.mxu0 %v2275_v62 }
 0xf99   :  { %2267 = vmatmul.msk.f32.vlgmr.msra.gmra.mxu0 %vm173_vm8, %v1713_v23 }
 0xf9a   :  { %1896 = vmatpush.msrb.mxu0 %v2274_v63 }
 0xf9c   :  { %1741 = vrot.lane.b32.xlu2 %v2889_v28, %s3215_s20 }
 0xff7   :  { %v1710_v25 = vpop.xlane.xlu2 %1709 }
 0xff8   :  { %2425 = vrcp.f32 %v1710_v25 }
 0xffe   :  { %v2426_v27 = vpop.eup %2425 }
 0xfff   :  { %v1714_v0 = vmul.f32 %v2426_v27, %v2420_v15  ;;  %v1742_v29 = vpop.permute.xlu2 %1741  ;;  %v2335_v15 = vld [vmem:[%s3183_s8 + $0x1] ss:$0 sm:$0xff] }
0x1000   :  { %1762 = vmatpush.msra.mxu1 %v1742_v29 }
0x1001   :  { %2268 = vmatmul.msk.f32.vlgmr.msra.gmra.mxu1 %vm173_vm8, %v1714_v0 }
0x100e   :  { %v1601_v59 = vpop.f32.mrf.mxu0 }
0x100f   :  { %2262 = vmatmul.msk.f32.gmra.mxu3 %vm173_vm8, %v1601_v59 }
0x1016   :  { %v1738_v30 = vpop.f32.mrf.mxu0 }
0x1017   :  { %2269 = vmatmul.msk.f32.vlgmr.msrb.gmra.mxu2 %vm173_vm8, %v1738_v30  ;;  %v2336_v30 = vld [vmem:[%s3184_s10 + $0x1] ss:$0 sm:$0xff] }
0x107e   :  { %v1764_v28 = vpop.f32.mrf.mxu1 }
0x107f   :  { %2270 = vmatmul.msk.f32.gmra.mxu2 %vm173_vm8, %v1764_v28 }
0x1092   :  { %v1630_v42 = vpop.f32.mrf.mxu3 }
0x1093   :  { %v1634_v31 = vadd.f32 %v1630_v42, %v1470_v44  ;;  %v2284_v44 = vld [vmem:[%s3186_s11 + $0x58] sm:$0xff] }
0x109a   :  { %v1790_v36 = vpop.f32.mrf.mxu2 }
0x109b   :  { %v1796_v37 = vadd.f32 %v1790_v36, %v1633_v35  ;;  %v2288_v36 = vld [vmem:[%s3186_s11 + $0x78] sm:$0xff] }
0x109c   :  { %2012 = vmatpush.msra.mxu3 %v2288_v36 }
0x109d   :  { %v1798_v39 = vadd.f32 %v1796_v37, %v2832_v56  ;;  %v2287_v37 = vld [vmem:[%s3186_s11 + $0x70] sm:$0xff] }
0x109e   :  { %2013 = vmatpush.msra.mxu3 %v2287_v37 }
0x109f   :  { %v3014_v40 = vadd.f32 %v2333_v38, %v1798_v39  ;;  %v2285_v39 = vld [vmem:[%s3186_s11 + $0x60] sm:$0xff] }
0x10a1   :  { %v1811_v41 = vsel %vm65_vm0, %v3014_v40, 0.0 }
0x10a2   :  { %1812 = vadd.xlane.f32.xlu1 %v1811_v41 }
0x1102   :  { %v1793_v45 = vpop.f32.mrf.mxu2 }
0x1103   :  { %v1797_v47 = vadd.f32 %v1793_v45, %v1634_v31  ;;  %v2283_v45 = vld [vmem:[%s3186_s11 + $0x50] sm:$0xff] }
0x1105   :  { %v1799_v48 = vadd.f32 %v1797_v47, %v2841_v55 }
0x1107   :  { %v3020_v49 = vadd.f32 %v2333_v38, %v1799_v48  ;;  %v2286_v38 = vld [vmem:[%s3186_s11 + $0x68] sm:$0xff] }
0x1108   :  { %2014 = vmatpush.msra.mxu3 %v2286_v38 }
0x1109   :  { %v1814_v58 = vsel %vm65_vm0, %v3020_v49, 0.0 }
0x110a   :  { %1815 = vadd.xlane.f32.xlu0 %v1814_v58  ;;  %2015 = vmatpush.msra.mxu3 %v2285_v39 }
0x110c   :  { %2016 = vmatpush.msra.mxu3 %v2284_v44 }
0x110e   :  { %2017 = vmatpush.msra.mxu3 %v2283_v45 }
0x1115   :  { %v1813_v56 = vpop.xlane.xlu1 %1812 }
0x1116   :  { %v1817_v51 = vmul.f32 %v1813_v56, %v2559_v10  ;;  %v2282_v56 = vld [vmem:[%s3186_s11 + $0x48] sm:$0xff] }
0x1117   :  { %2018 = vmatpush.msra.mxu3 %v2282_v56 }
0x1118   :  { %v1819_v52 = vsub.f32 %v3014_v40, %v1817_v51  ;;  %v2281_v51 = vld [vmem:[%s3186_s11 + $0x40] sm:$0xff] }
0x1119   :  { %2019 = vmatpush.msra.mxu3 %v2281_v51  ;;  %v2337_v51 = vld [vmem:[%s3187_s12 + $0x1] ss:$0 sm:$0xff] }
0x111a   :  { %v1821_v54 = vmul.f32 %v1819_v52, %v1819_v52 }
0x111c   :  { %v1823_v60 = vsel %vm65_vm0, %v1821_v54, 0.0 }
0x111d   :  { %1824 = vadd.xlane.f32.xlu2 %v1823_v60 }
0x117d   :  { %v1816_v50 = vpop.xlane.xlu0 %1815 }
0x117e   :  { %v1818_v2 = vmul.f32 %v1816_v50, %v2559_v10 }
0x1180   :  { %v1820_v55 = vsub.f32 %v3020_v49, %v1818_v2 }
0x1182   :  { %v1822_v61 = vmul.f32 %v1820_v55, %v1820_v55 }
0x1184   :  { %v1826_v43 = vsel %vm65_vm0, %v1822_v61, 0.0 }
0x1185   :  { %1827 = vadd.xlane.f32.xlu1 %v1826_v43 }
0x1190   :  { %v1825_v1 = vpop.xlane.xlu2 %1824 }
0x1191   :  { %v1829_v3 = vmul.f32 %v1825_v1, %v2559_v10 }
0x1193   :  { %v1831_v4 = vadd.f32 1e-05, %v1829_v3 }
0x1195   :  { %2427 = vrsqrt.f32 %v1831_v4  ;;  %vm1839_vm9 = vweird.f32 %v1831_v4 }
0x119b   :  { %v2428_v53 = vpop.eup %2427 }
0x119c   :  { %v1834_v5 = vmul.f32 %v2428_v53, %v1831_v4  ;;  %vm1840_vm8 = vweird.f32 %v2428_v53 }
0x119d   :  { %vm1841_vm5 = vmor %vm1839_vm9, %vm1840_vm8 }
0x119e   :  { %v1835_v6 = vmul.f32 %v2428_v53, %v1834_v5 }
0x11a0   :  { %v1836_v11 = vmul.f32 0.5, %v1835_v6 }
0x11a2   :  { %v1837_v8 = vsub.f32 1.5, %v1836_v11 }
0x11a4   :  { %v1838_v12 = vmul.f32 %v2428_v53, %v1837_v8 }
0x11a6   :  { %v1842_v14 = vsel %vm1841_vm5, %v2428_v53, %v1838_v12 }
0x11a7   :  { %v1853_v18 = vmul.f32 %v1842_v14, %v1819_v52 }
0x11a9   :  { %v1858_v16 = vmul.f32 %v2334_v13, %v1853_v18 }
0x11ab   :  { %v1863_v7 = vadd.f32 %v2335_v15, %v1858_v16 }
0x11ad   :  { %2279 = vmatmul.msk.f32.vlgmr.msrb.gmra.mxu0 %vm65_vm0, %v1863_v7 }
0x11f8   :  { %v1828_v17 = vpop.xlane.xlu1 %1827 }
0x11f9   :  { %v1830_v19 = vmul.f32 %v1828_v17, %v2559_v10 }
0x11fb   :  { %v1832_v20 = vadd.f32 1e-05, %v1830_v19 }
0x11fd   :  { %2429 = vrsqrt.f32 %v1832_v20  ;;  %vm1849_vm10 = vweird.f32 %v1832_v20 }
0x1203   :  { %v2430_v21 = vpop.eup %2429 }
0x1204   :  { %v1844_v9 = vmul.f32 %v2430_v21, %v1832_v20  ;;  %vm1850_vm7 = vweird.f32 %v2430_v21 }
0x1205   :  { %vm1851_vm11 = vmor %vm1849_vm10, %vm1850_vm7 }
0x1206   :  { %v1845_v22 = vmul.f32 %v2430_v21, %v1844_v9 }
0x1208   :  { %v1846_v23 = vmul.f32 0.5, %v1845_v22 }
0x120a   :  { %v1847_v24 = vsub.f32 1.5, %v1846_v23 }
0x120c   :  { %v1848_v25 = vmul.f32 %v2430_v21, %v1847_v24 }
0x120e   :  { %v1852_v27 = vsel %vm1851_vm11, %v2430_v21, %v1848_v25 }
0x120f   :  { %v1854_v0 = vmul.f32 %v1852_v27, %v1820_v55 }
0x1211   :  { %v1859_v29 = vmul.f32 %v2334_v13, %v1854_v0 }
0x1213   :  { %v1864_v59 = vadd.f32 %v2335_v15, %v1859_v29 }
0x1215   :  { %2280 = vmatmul.msk.f32.gmra.mxu0 %vm65_vm0, %v1864_v59 }
0x122a   :  { %v1898_v28 = vpop.f32.mrf.mxu0 }
0x122b   :  { %v1899_v32 = vadd.f32 %v2336_v30, %v1898_v28 }
0x122d   :  { %v1906_v33 = vmul.f32 0.70710677, %v1899_v32  ;;  %v1904_v13 = vmul.f32 0.5, %v1899_v32 }
0x122f   :  { %v1908_v26 = vand.u32 2147483647, %v1906_v33  ;;  %vm1974_vm1 = vcmp.ge.f32.partialorder %v1906_v33, 0.0 }
0x1231   :  { %v1910_v34 = vmul.f32 0.3275911, %v1908_v26  ;;  %v1962_v2 = vsub.f32 0.0, %v1908_v26 }
0x1233   :  { %v1912_v35 = vadd.f32 1.0, %v1910_v34  ;;  %v1964_v43 = vmul.f32 %v1962_v2, %v1908_v26  ;;  %v2100_v2 = vld [vmem:[%s3188_s15 + $0x78] sm:$0xff] }
0x1234   :  { %2292 = vmatpush.xpose.msk.msrb.mxu1 %vm65_vm0, %v2100_v2 }
0x1235   :  { %2431 = vrcp.f32 %v1912_v35  ;;  %v1925_v47 = vand.u32 2147483648, %v1912_v35  ;;  %v1923_v58 = vand.u32 2147483647, %v1912_v35  ;;  %vm1919_vm13 = vweird.f32 %v1912_v35 }
0x1236   :  { %v1966_v62 = vmul.f32 1.442695, %v1964_v43 }
0x1237   :  { %v1926_v54 = vor.u32 1.1754944e-38, %v1925_v47  ;;  %vm1924_vm15 = vcmp.eq.f32.partialorder %v1923_v58, 8.507059e+37 }
0x1238   :  { %2433 = vpow2.f32 %v1966_v62 }
0x123b   :  { %v2432_v41 = vpop.eup %2431 }
0x123c   :  { %v1915_v42 = vmul.f32 %v2432_v41, %v1912_v35  ;;  %vm1920_vm12 = vweird.f32 %v2432_v41 }
0x123d   :  { %vm1921_vm14 = vmor %vm1919_vm13, %vm1920_vm12 }
0x123e   :  { %v1916_v31 = vsub.f32 1.0, %v1915_v42  ;;  %v2434_v5 = vpop.eup %2433 }
0x1240   :  { %v1917_v48 = vmul.f32 %v2432_v41, %v1916_v31 }
0x1242   :  { %v1918_v52 = vadd.f32 %v2432_v41, %v1917_v48 }
0x1244   :  { %v1922_v60 = vsel %vm1921_vm14, %v2432_v41, %v1918_v52 }
0x1245   :  { %v1927_v50 = vsel %vm1924_vm15, %v1926_v54, %v1922_v60 }
0x1246   :  { %v1944_v55 = vmul.f32 1.0614054, %v1927_v50 }
0x1248   :  { %v1946_v61 = vadd.f32 -1.4531521, %v1944_v55  ;;  %v2099_v55 = vld [vmem:[%s3188_s15 + $0x70] sm:$0xff] }
0x1249   :  { %2293 = vmatpush.xpose.msk.msrb.mxu1 %vm65_vm0, %v2099_v55 }
0x124a   :  { %v1948_v46 = vmul.f32 %v1946_v61, %v1927_v50  ;;  %v2098_v61 = vld [vmem:[%s3188_s15 + $0x68] sm:$0xff] }
0x124c   :  { %v1950_v57 = vadd.f32 1.4214138, %v1948_v46 }
0x124d   :  { %2294 = vmatpush.xpose.msk.msrb.mxu1 %vm65_vm0, %v2098_v61 }
0x124e   :  { %v1952_v63 = vmul.f32 %v1950_v57, %v1927_v50  ;;  %v2097_v57 = vld [vmem:[%s3188_s15 + $0x60] sm:$0xff] }
0x1250   :  { %v1954_v1 = vadd.f32 -0.28449672, %v1952_v63 }
0x1251   :  { %2295 = vmatpush.xpose.msk.msrb.mxu1 %vm65_vm0, %v2097_v57 }
0x1252   :  { %v1956_v3 = vmul.f32 %v1954_v1, %v1927_v50 }
0x1254   :  { %v1958_v4 = vadd.f32 0.2548296, %v1956_v3 }
0x1256   :  { %v1960_v53 = vmul.f32 %v1958_v4, %v1927_v50 }
0x1258   :  { %v1970_v6 = vmul.f32 %v2434_v5, %v1960_v53  ;;  %v2095_v5 = vld [vmem:[%s3188_s15 + $0x50] sm:$0xff] }
0x125a   :  { %v1972_v11 = vsub.f32 1.0, %v1970_v6  ;;  %v2094_v6 = vld [vmem:[%s3188_s15 + $0x48] sm:$0xff] }
0x125c   :  { %v1976_v8 = vsub.f32 0.0, %v1972_v11 }
0x125e   :  { %v1978_v12 = vsel %vm1974_vm1, %v1972_v11, %v1976_v8  ;;  %v2093_v11 = vld [vmem:[%s3188_s15 + $0x40] sm:$0xff]  ;;  %v2092_v8 = vld [vmem:[%s3188_s15 + $0x38] sm:$0xff] }
0x125f   :  { %v1980_v14 = vadd.f32 1.0, %v1978_v12  ;;  %v2091_v12 = vld [vmem:[%s3188_s15 + $0x30] sm:$0xff] }
0x1261   :  { %v1982_v18 = vmul.f32 %v1980_v14, %v1904_v13  ;;  %v2090_v13 = vld [vmem:[%s3188_s15 + $0x28] sm:$0xff]  ;;  %v2089_v14 = vld [vmem:[%s3188_s15 + $0x20] sm:$0xff] }
0x1263   :  { %2290 = vmatmul.msk.f32.vlgmr.msra.gmra.mxu3 %vm1014_vm6, %v1982_v18 }
0x1292   :  { %v1901_v15 = vpop.f32.mrf.mxu0 }
0x1293   :  { %v1902_v16 = vadd.f32 %v2336_v30, %v1901_v15 }
0x1295   :  { %v1907_v7 = vmul.f32 0.70710677, %v1902_v16  ;;  %v1905_v48 = vmul.f32 0.5, %v1902_v16  ;;  %v2088_v16 = vld [vmem:[%s3188_s15 + $0x18] sm:$0xff] }
0x1297   :  { %v1909_v17 = vand.u32 2147483647, %v1907_v7  ;;  %vm1975_vm9 = vcmp.ge.f32.partialorder %v1907_v7, 0.0 }
0x1299   :  { %v1911_v19 = vmul.f32 0.3275911, %v1909_v17  ;;  %v1963_v59 = vsub.f32 0.0, %v1909_v17 }
0x129b   :  { %v1913_v20 = vadd.f32 1.0, %v1911_v19  ;;  %v1965_v33 = vmul.f32 %v1963_v59, %v1909_v17  ;;  %v2087_v19 = vld [vmem:[%s3188_s15 + $0x10] sm:$0xff] }
0x129d   :  { %2435 = vrcp.f32 %v1913_v20  ;;  %v1940_v23 = vand.u32 2147483648, %v1913_v20  ;;  %v1938_v25 = vand.u32 2147483647, %v1913_v20  ;;  %vm1934_vm3 = vweird.f32 %v1913_v20 }
0x129e   :  { %v1968_v35 = vmul.f32 1.442695, %v1965_v33 }
0x129f   :  { %v1941_v0 = vor.u32 1.1754944e-38, %v1940_v23  ;;  %vm1939_vm8 = vcmp.eq.f32.partialorder %v1938_v25, 8.507059e+37 }
0x12a0   :  { %2437 = vpow2.f32 %v1968_v35 }
0x12a3   :  { %v2436_v21 = vpop.eup %2435 }
0x12a4   :  { %v1930_v9 = vmul.f32 %v2436_v21, %v1913_v20  ;;  %vm1935_vm2 = vweird.f32 %v2436_v21 }
0x12a5   :  { %vm1936_vm4 = vmor %vm1934_vm3, %vm1935_vm2 }
0x12a6   :  { %v1931_v22 = vsub.f32 1.0, %v1930_v9  ;;  %v2438_v42 = vpop.eup %2437  ;;  %v2085_v9 = vld [vmem:[%s3188_s15] sm:$0xff] }
0x12a8   :  { %v1932_v24 = vmul.f32 %v2436_v21, %v1931_v22 }
0x12aa   :  { %v1933_v27 = vadd.f32 %v2436_v21, %v1932_v24 }
0x12ac   :  { %v1937_v29 = vsel %vm1936_vm4, %v2436_v21, %v1933_v27  ;;  %v2086_v21 = vld [vmem:[%s3188_s15 + $0x8] sm:$0xff] }
0x12ad   :  { %v1942_v30 = vsel %vm1939_vm8, %v1941_v0, %v1937_v29 }
0x12ae   :  { %v1945_v28 = vmul.f32 1.0614054, %v1942_v30 }
0x12b0   :  { %v1947_v32 = vadd.f32 -1.4531521, %v1945_v28  ;;  %v2338_v28 = vld [vmem:[%s3189_s13] ss:$0 sm:$0xff] }
0x12b2   :  { %v1949_v26 = vmul.f32 %v1947_v32, %v1942_v30 }
0x12b4   :  { %v1951_v34 = vadd.f32 1.4214138, %v1949_v26  ;;  %v2339_v26 = vld [vmem:[%s3190_s14] ss:$0 sm:$0xff] }
0x12b6   :  { %v1953_v36 = vmul.f32 %v1951_v34, %v1942_v30 }
0x12b8   :  { %v1955_v37 = vadd.f32 -0.28449672, %v1953_v36 }
0x12ba   :  { %v1957_v38 = vmul.f32 %v1955_v37, %v1942_v30 }
0x12bc   :  { %v1959_v39 = vadd.f32 0.2548296, %v1957_v38 }
0x12be   :  { %v1961_v41 = vmul.f32 %v1959_v39, %v1942_v30 }
0x12c0   :  { %v1971_v44 = vmul.f32 %v2438_v42, %v1961_v41 }
0x12c2   :  { %v1973_v31 = vsub.f32 1.0, %v1971_v44 }
0x12c4   :  { %v1977_v45 = vsub.f32 0.0, %v1973_v31 }
0x12c6   :  { %v1979_v47 = vsel %vm1975_vm9, %v1973_v31, %v1977_v45 }
0x12c7   :  { %v1981_v58 = vadd.f32 1.0, %v1979_v47 }
0x12c9   :  { %v1983_v56 = vmul.f32 %v1981_v58, %v1905_v48 }
0x12cb   :  { %2291 = vmatmul.msk.f32.gmra.mxu3 %vm1014_vm6, %v1983_v56 }
0x12e6   :  { %v2021_v52 = vpop.f32.mrf.mxu3 }
0x12e7   :  { %v2022_v54 = vadd.f32 %v2337_v51, %v2021_v52 }
0x12e9   :  { %v2027_v60 = vadd.f32 %v2022_v54, %v3014_v40 }
0x12eb   :  { %v2031_v50 = vsel %vm65_vm0, %v2027_v60, 0.0 }
0x12ec   :  { %2032 = vadd.xlane.f32.xlu0 %v2031_v50 }
0x134e   :  { %v2024_v40 = vpop.f32.mrf.mxu3 }
0x134f   :  { %v2025_v43 = vadd.f32 %v2337_v51, %v2024_v40 }
0x1351   :  { %v2028_v46 = vadd.f32 %v2025_v43, %v3020_v49  ;;  %v2096_v49 = vld [vmem:[%s3188_s15 + $0x58] sm:$0xff] }
0x1352   :  { %2296 = vmatpush.xpose.msk.msrb.mxu1 %vm65_vm0, %v2096_v49 }
0x1353   :  { %v2034_v62 = vsel %vm65_vm0, %v2028_v46, 0.0 }
0x1354   :  { %2035 = vadd.xlane.f32.xlu1 %v2034_v62 }
0x1356   :  { %2297 = vmatpush.xpose.msk.msrb.mxu1 %vm65_vm0, %v2095_v5 }
0x135a   :  { %2298 = vmatpush.xpose.msk.msrb.mxu1 %vm65_vm0, %v2094_v6 }
0x135e   :  { %2299 = vmatpush.xpose.msk.msrb.mxu1 %vm65_vm0, %v2093_v11 }
0x135f   :  { %v2033_v63 = vpop.xlane.xlu0 %2032 }
0x1360   :  { %v2037_v1 = vmul.f32 %v2033_v63, %v2559_v10 }
0x1362   :  { %v2039_v3 = vsub.f32 %v2027_v60, %v2037_v1  ;;  %2300 = vmatpush.xpose.msk.msrb.mxu1 %vm65_vm0, %v2092_v8 }
0x1364   :  { %v2041_v4 = vmul.f32 %v2039_v3, %v2039_v3 }
0x1366   :  { %v2043_v53 = vsel %vm65_vm0, %v2041_v4, 0.0  ;;  %2301 = vmatpush.xpose.msk.msrb.mxu1 %vm65_vm0, %v2091_v12 }
0x1367   :  { %2044 = vadd.xlane.f32.xlu2 %v2043_v53 }
0x136a   :  { %2302 = vmatpush.xpose.msk.msrb.mxu1 %vm65_vm0, %v2090_v13 }
0x136e   :  { %2303 = vmatpush.xpose.msk.msrb.mxu1 %vm65_vm0, %v2089_v14 }
0x1372   :  { %2304 = vmatpush.xpose.msk.msrb.mxu1 %vm65_vm0, %v2088_v16 }
0x1376   :  { %2305 = vmatpush.xpose.msk.msrb.mxu1 %vm65_vm0, %v2087_v19 }
0x137a   :  { %2306 = vmatpush.xpose.msk.msrb.mxu1 %vm65_vm0, %v2086_v21 }
0x137e   :  { %2307 = vmatpush.xpose.msk.msrb.mxu1 %vm65_vm0, %v2085_v9 }
0x13c7   :  { %v2036_v18 = vpop.xlane.xlu1 %2035 }
0x13c8   :  { %v2038_v15 = vmul.f32 %v2036_v18, %v2559_v10 }
0x13ca   :  { %v2040_v7 = vsub.f32 %v2028_v46, %v2038_v15 }
0x13cc   :  { %v2042_v17 = vmul.f32 %v2040_v7, %v2040_v7 }
0x13ce   :  { %v2046_v20 = vsel %vm65_vm0, %v2042_v17, 0.0 }
0x13cf   :  { %2047 = vadd.xlane.f32.xlu0 %v2046_v20 }
0x13da   :  { %v2045_v22 = vpop.xlane.xlu2 %2044 }
0x13db   :  { %v2049_v23 = vmul.f32 %v2045_v22, %v2559_v10 }
0x13dd   :  { %v2051_v24 = vadd.f32 1e-05, %v2049_v23 }
0x13df   :  { %2439 = vrsqrt.f32 %v2051_v24  ;;  %vm2059_vm5 = vweird.f32 %v2051_v24 }
0x13e5   :  { %v2440_v25 = vpop.eup %2439 }
0x13e6   :  { %v2054_v27 = vmul.f32 %v2440_v25, %v2051_v24  ;;  %vm2060_vm6 = vweird.f32 %v2440_v25 }
0x13e7   :  { %vm2061_vm7 = vmor %vm2059_vm5, %vm2060_vm6 }
0x13e8   :  { %v2055_v0 = vmul.f32 %v2440_v25, %v2054_v27 }
0x13ea   :  { %v2056_v29 = vmul.f32 0.5, %v2055_v0 }
0x13ec   :  { %v2057_v59 = vsub.f32 1.5, %v2056_v29 }
0x13ee   :  { %v2058_v30 = vmul.f32 %v2440_v25, %v2057_v59 }
0x13f0   :  { %v2062_v32 = vsel %vm2061_vm7, %v2440_v25, %v2058_v30 }
0x13f1   :  { %v2073_v33 = vmul.f32 %v2062_v32, %v2039_v3 }
0x13f3   :  { %v2078_v34 = vmul.f32 %v2338_v28, %v2073_v33 }
0x13f5   :  { %v2083_v35 = vadd.f32 %v2339_v26, %v2078_v34 }
0x13f7   :  { %2308 = vmatmul.msk.f32.vlgmr.msrb.gmra.mxu1 %vm65_vm0, %v2083_v35 }
0x1442   :  { %v2048_v36 = vpop.xlane.xlu0 %2047 }
0x1443   :  { %v2050_v37 = vmul.f32 %v2048_v36, %v2559_v10  ;;  %v2340_v10 = vld [vmem:[%s3191_s16] ss:$0 sm:$0xff] }
0x1445   :  { %v2052_v38 = vadd.f32 1e-05, %v2050_v37 }
0x1447   :  { %2441 = vrsqrt.f32 %v2052_v38  ;;  %vm2069_vm11 = vweird.f32 %v2052_v38 }
0x144d   :  { %v2442_v39 = vpop.eup %2441 }
0x144e   :  { %v2064_v41 = vmul.f32 %v2442_v39, %v2052_v38  ;;  %vm2070_vm10 = vweird.f32 %v2442_v39 }
0x144f   :  { %vm2071_vm12 = vmor %vm2069_vm11, %vm2070_vm10 }
0x1450   :  { %v2065_v42 = vmul.f32 %v2442_v39, %v2064_v41 }
0x1452   :  { %v2066_v44 = vmul.f32 0.5, %v2065_v42 }
0x1454   :  { %v2067_v31 = vsub.f32 1.5, %v2066_v44 }
0x1456   :  { %v2068_v45 = vmul.f32 %v2442_v39, %v2067_v31 }
0x1458   :  { %v2072_v47 = vsel %vm2071_vm12, %v2442_v39, %v2068_v45 }
0x1459   :  { %v2074_v48 = vmul.f32 %v2072_v47, %v2040_v7 }
0x145b   :  { %v2079_v58 = vmul.f32 %v2338_v28, %v2074_v48 }
0x145d   :  { %v2084_v56 = vadd.f32 %v2339_v26, %v2079_v58 }
0x145f   :  { %2309 = vmatmul.msk.f32.gmra.mxu1 %vm65_vm0, %v2084_v56 }
0x1474   :  { %v2176_v51 = vpop.f32.mrf.mxu1 }
0x1475   :  { %v2177_v52 = vadd.f32 %v2340_v10, %v2176_v51 }
0x1477   :  { %2182 = vst [vmem:[%s3192_s17] sm:$0xff] %v2177_v52 }
0x14dc   :  { %v2179_v54 = vpop.f32.mrf.mxu1 }
0x14dd   :  { %v2180_v60 = vadd.f32 %v2340_v10, %v2179_v54 }
0x14df   :  { %2183 = vst [vmem:[%s3192_s17 + $0x8] sm:$0xff] %v2180_v60 }

</bundles_post_ra>
